<compile_context>
chip_gen: v5e
topology: v5e:2x2
jax: 0.10.0
libtpu: 0.0.40
codegen_flags: <defaults>
</compile_context>

<pallas_src>
import functools

import jax
import jax.numpy as jnp
from jax.experimental import pallas as pl
from jax.experimental.pallas import tpu as pltpu

# ----------------------------- model config ---------------------------------
INPUT_SIZE = 16
MODEL_DIM = 32
NUM_HEADS = 4
NUM_LAYERS = 2
OUTPUT_SIZE = 8
FFN_DIM = 2048            # nn.TransformerEncoderLayer default dim_feedforward
LN_EPS = 1e-5             # nn.LayerNorm default eps
MAX_POS = 1000            # positional_encoding table length
FFN_CHUNK = 512           # FFN hidden-dim chunk (caps live vregs)

BATCH = 2
SEQ = 8


def _layer_norm(x, g, b):
    mu = jnp.mean(x, axis=-1, keepdims=True)
    xc = x - mu
    var = jnp.mean(xc * xc, axis=-1, keepdims=True)
    inv = jax.lax.rsqrt(var + LN_EPS)
    return xc * inv * g + b


# -------------------- fused per-layer (grid) kernel --------------------------
def fused_layer_kernel(
        x_ref, posb_ref, wp_ref,                    # layer-0-only inputs
        wqkv_ref, wo_ref, vec_ref,                  # per-layer attention params
        w1_ref, bf1_ref, w2_ref,                    # per-layer FFN params
        wf_ref, bfc_ref,                            # last-layer-only inputs
        o_ref,                                      # (B, O) output
        h_ref,                                      # (B*S, D) VMEM scratch (carried)
        *, batch, seq):
    l = pl.program_id(0)
    last = pl.num_programs(0) - 1
    D = MODEL_DIM
    H = NUM_HEADS
    hd = D // H
    B, S = batch, seq
    BS = B * S

    # ---- layer 0: input projection + (pos_enc + input-proj bias) -----------
    @pl.when(l == 0)
    def _():
        h_ref[...] = (jnp.dot(x_ref[...].astype(jnp.bfloat16), wp_ref[...],
                              preferred_element_type=jnp.float32)
                      + posb_ref[...])

    h = h_ref[...]                                               # (BS, D) f32

    # ---- unpack the small-parameter slab (rows of an (8,128) f32 tile) -----
    bqkv = vec_ref[0:1, 0:3 * D]                                 # (1, 3D)
    bo = vec_ref[1:2, 0:D]
    g1 = vec_ref[2:3, 0:D]
    be1 = vec_ref[3:4, 0:D]
    g2 = vec_ref[4:5, 0:D]
    be2 = vec_ref[5:6, 0:D]
    bf2 = vec_ref[6:7, 0:D]

    # ---- multi-head self-attention (post-norm encoder layer) ---------------
    # 1/sqrt(hd) is already folded into the Q columns of wqkv/bqkv.
    qkv = jnp.dot(h.astype(jnp.bfloat16), wqkv_ref[...],
                  preferred_element_type=jnp.float32) + bqkv     # (BS, 3D)

    ctxs = []
    for hh in range(H):                                          # static unroll
        c0 = hh * hd
        qh = qkv[:, c0:c0 + hd].reshape(B, S, hd).astype(jnp.bfloat16)
        kh = qkv[:, D + c0:D + c0 + hd].reshape(B, S, hd).astype(jnp.bfloat16)
        vh = qkv[:, 2 * D + c0:2 * D + c0 + hd].reshape(B, S, hd).astype(jnp.bfloat16)
        s = jnp.einsum('bqd,bkd->bqk', qh, kh,
                       preferred_element_type=jnp.float32)       # (B,S,S)
        s = s - jnp.max(s, axis=-1, keepdims=True)
        p = jnp.exp(s)
        p = p * pl.reciprocal(jnp.sum(p, axis=-1, keepdims=True), approx=True)
        ctx = jnp.einsum('bqk,bkd->bqd', p.astype(jnp.bfloat16), vh,
                         preferred_element_type=jnp.float32)     # (B,S,hd)
        ctxs.append(ctx.reshape(BS, hd))
    ctx_all = jnp.concatenate(ctxs, axis=-1)                     # (BS, D)

    # single K=D output projection for all heads
    attn = jnp.dot(ctx_all.astype(jnp.bfloat16), wo_ref[...],
                   preferred_element_type=jnp.float32) + bo

    h = _layer_norm(h + attn, g1, be1)                           # post-norm 1

    # ---- position-wise FFN (ReLU), chunked over hidden dim -----------------
    hb = h.astype(jnp.bfloat16)
    h2 = jnp.zeros((BS, D), jnp.float32)
    for c0 in range(0, FFN_DIM, FFN_CHUNK):                      # static unroll
        h1 = (jnp.dot(hb, w1_ref[:, c0:c0 + FFN_CHUNK],
                      preferred_element_type=jnp.float32)
              + bf1_ref[:, c0:c0 + FFN_CHUNK])
        h1 = jnp.maximum(h1, 0.0).astype(jnp.bfloat16)
        h2 = h2 + jnp.dot(h1, w2_ref[c0:c0 + FFN_CHUNK, :],
                          preferred_element_type=jnp.float32)
    h2 = h2 + bf2

    h = _layer_norm(h + h2, g2, be2)                             # post-norm 2
    h_ref[...] = h                                               # carry to next layer

    # ---- last layer: mean over sequence + final fc (dropout = identity) ----
    @pl.when(l == last)
    def _():
        m = jnp.sum(h.reshape(B, S, D), axis=1) * (1.0 / S)      # (B, D)
        o_ref[...] = (jnp.dot(m.astype(jnp.bfloat16), wf_ref[...],
                              preferred_element_type=jnp.float32)
                      + bfc_ref[...])


# ----------------------------- parameters -----------------------------------
def init_params(key):
    D, I, F, O, L, H = MODEL_DIM, INPUT_SIZE, FFN_DIM, OUTPUT_SIZE, NUM_LAYERS, NUM_HEADS
    hd = D // H
    scale = 1.0 / float(hd) ** 0.5
    ks = jax.random.split(key, 3 + L)

    def lin_t(k, in_f, out_f, s=0.05):
        """PyTorch-style (out,in) weight, returned pre-transposed to (in,out)."""
        kw, kb = jax.random.split(k)
        w = jax.random.normal(kw, (out_f, in_f), jnp.float32) * s
        b = jax.random.normal(kb, (1, out_f), jnp.float32) * s
        return w.T, b

    wp_t, bp = lin_t(ks[0], I, D)
    pos = jax.random.normal(ks[1], (MAX_POS, D), jnp.float32)    # torch.randn(1000, D)
    wf_t, bfc = lin_t(ks[2], D, O)

    wqkv_l, wo_l, w1_l, bf1_l, w2_l, vec_l = [], [], [], [], [], []
    for li in range(L):
        lk = jax.random.split(ks[3 + li], 4)
        wqkv_t, bqkv = lin_t(lk[0], D, 3 * D)
        # fold the attention scale 1/sqrt(hd) into the Q projection
        wqkv_t = wqkv_t.at[:, :D].multiply(scale)
        bqkv = bqkv.at[:, :D].multiply(scale)
        wo_t, bo = lin_t(lk[1], D, D)
        w1_t, bf1 = lin_t(lk[2], D, F)
        w2_t, bf2 = lin_t(lk[3], F, D)

        # small-parameter slab: one (8,128) f32 tile per layer
        vec = jnp.zeros((8, 128), jnp.float32)
        vec = vec.at[0, :3 * D].set(bqkv[0])
        vec = vec.at[1, :D].set(bo[0])
        vec = vec.at[2, :D].set(jnp.ones((D,), jnp.float32))     # LN1 gamma
        vec = vec.at[3, :D].set(jnp.zeros((D,), jnp.float32))    # LN1 beta
        vec = vec.at[4, :D].set(jnp.ones((D,), jnp.float32))     # LN2 gamma
        vec = vec.at[5, :D].set(jnp.zeros((D,), jnp.float32))    # LN2 beta
        vec = vec.at[6, :D].set(bf2[0])

        wqkv_l.append(wqkv_t.astype(jnp.bfloat16))
        wo_l.append(wo_t.astype(jnp.bfloat16))
        w1_l.append(w1_t.astype(jnp.bfloat16))
        bf1_l.append(bf1)
        w2_l.append(w2_t.astype(jnp.bfloat16))
        vec_l.append(vec)

    return dict(
        wp_t=wp_t.astype(jnp.bfloat16), bp=bp, pos=pos,
        wf_t=wf_t.astype(jnp.bfloat16), bfc=bfc,
        wqkv_t=jnp.stack(wqkv_l), wo_t=jnp.stack(wo_l),
        w1_t=jnp.stack(w1_l), bf1=jnp.stack(bf1_l), w2_t=jnp.stack(w2_l),
        vec=jnp.stack(vec_l),
    )


# ------------------------------- forward -------------------------------------
@jax.jit
def forward(x, params):
    B, S, I = x.shape
    BS = B * S
    D, F, O, L = MODEL_DIM, FFN_DIM, OUTPUT_SIZE, NUM_LAYERS

    x_flat = x.reshape(BS, I)                       # fold batch into sublanes
    # positional encoding slice, tiled over batch, with the input-projection
    # bias folded in (tiny (BS,D) prep op outside the kernel).
    posb = jnp.tile(params["pos"][:S, :], (B, 1)) + params["bp"]

    kernel = functools.partial(fused_layer_kernel, batch=B, seq=S)

    grid_spec = pltpu.PrefetchScalarGridSpec(
        num_scalar_prefetch=0,
        grid=(L,),
        in_specs=[
            pl.BlockSpec((BS, I), lambda l: (0, 0)),               # x (layer 0)
            pl.BlockSpec((BS, D), lambda l: (0, 0)),               # pos + bias
            pl.BlockSpec((I, D), lambda l: (0, 0)),                # wp_t
            pl.BlockSpec((None, D, 3 * D), lambda l: (l, 0, 0)),   # wqkv_t
            pl.BlockSpec((None, D, D), lambda l: (l, 0, 0)),       # wo_t
            pl.BlockSpec((None, 8, 128), lambda l: (l, 0, 0)),     # small-param slab
            pl.BlockSpec((None, D, F), lambda l: (l, 0, 0)),       # w1_t
            pl.BlockSpec((None, 1, F), lambda l: (l, 0, 0)),       # bf1
            pl.BlockSpec((None, F, D), lambda l: (l, 0, 0)),       # w2_t
            pl.BlockSpec((D, O), lambda l: (0, 0)),                # wf_t (last layer)
            pl.BlockSpec((1, O), lambda l: (0, 0)),                # bfc  (last layer)
        ],
        out_specs=pl.BlockSpec((B, O), lambda l: (0, 0)),
        scratch_shapes=[pltpu.VMEM((BS, D), jnp.float32)],         # carried activation
    )

    return pl.pallas_call(
        kernel,
        out_shape=jax.ShapeDtypeStruct((B, O), jnp.float32),
        grid_spec=grid_spec,
        compiler_params=pltpu.CompilerParams(
            dimension_semantics=("arbitrary",)),
    )(x_flat, posb, params["wp_t"],
      params["wqkv_t"], params["wo_t"], params["vec"],
      params["w1_t"], params["bf1"], params["w2_t"],
      params["wf_t"], params["bfc"])


if __name__ == "__main__":
    key = jax.random.PRNGKey(0)
    kx, kp = jax.random.split(key)
    x = jax.random.normal(kx, (BATCH, SEQ, INPUT_SIZE), jnp.float32)
    params = init_params(kp)

    out = forward(x, params)
    out = jax.block_until_ready(out)
    assert out.shape == (BATCH, OUTPUT_SIZE)
    assert bool(jnp.all(jnp.isfinite(out)))
    print("KERNEL_OK")
</pallas_src>

<mosaic_0001>
module attributes {stable_mosaic.version = 11 : i64} {
  func.func @fused_layer_kernel(%arg0: i32, %arg1: memref<16x16xf32, #tpu.memory_space<vmem>>, %arg2: memref<16x32xf32, #tpu.memory_space<vmem>>, %arg3: memref<16x32xbf16, #tpu.memory_space<vmem>>, %arg4: memref<1x32x96xbf16, #tpu.memory_space<vmem>>, %arg5: memref<1x32x32xbf16, #tpu.memory_space<vmem>>, %arg6: memref<1x8x128xf32, #tpu.memory_space<vmem>>, %arg7: memref<1x32x2048xbf16, #tpu.memory_space<vmem>>, %arg8: memref<1x1x2048xf32, #tpu.memory_space<vmem>>, %arg9: memref<1x2048x32xbf16, #tpu.memory_space<vmem>>, %arg10: memref<32x8xbf16, #tpu.memory_space<vmem>>, %arg11: memref<1x8xf32, #tpu.memory_space<vmem>>, %arg12: memref<2x8xf32, #tpu.memory_space<vmem>>, %arg13: memref<16x32xf32, #tpu.memory_space<vmem>>) attributes {dimension_semantics = [#tpu.dimension_semantics<arbitrary>], iteration_bounds = array<i64: 2>, scalar_prefetch = 0 : i64, scratch_operands = 1 : i64, tpu.core_type = #tpu.core_type<tc>, window_params = [{pipeline_mode = #tpu.pipeline_mode<synchronous>, transform_indices = @transform_0, window_bounds = array<i64: 16, 16>}, {pipeline_mode = #tpu.pipeline_mode<synchronous>, transform_indices = @transform_1, window_bounds = array<i64: 16, 32>}, {pipeline_mode = #tpu.pipeline_mode<synchronous>, transform_indices = @transform_2, window_bounds = array<i64: 16, 32>}, {transform_indices = @transform_3, window_bounds = array<i64: 1, 32, 96>}, {transform_indices = @transform_4, window_bounds = array<i64: 1, 32, 32>}, {transform_indices = @transform_5, window_bounds = array<i64: 1, 8, 128>}, {transform_indices = @transform_6, window_bounds = array<i64: 1, 32, 2048>}, {transform_indices = @transform_7, window_bounds = array<i64: 1, 1, 2048>}, {transform_indices = @transform_8, window_bounds = array<i64: 1, 2048, 32>}, {pipeline_mode = #tpu.pipeline_mode<synchronous>, transform_indices = @transform_9, window_bounds = array<i64: 32, 8>}, {pipeline_mode = #tpu.pipeline_mode<synchronous>, transform_indices = @transform_10, window_bounds = array<i64: 1, 8>}, {pipeline_mode = #tpu.pipeline_mode<synchronous>, transform_indices = @transform_11, window_bounds = array<i64: 2, 8>}]} {
    %c0_i32 = arith.constant 0 : i32
    %0 = arith.cmpi eq, %arg0, %c0_i32 : i32
    %1 = arith.extui %0 : i1 to i32
    %c0_i32_0 = arith.constant 0 : i32
    %2 = arith.cmpi ne, %1, %c0_i32_0 : i32
    scf.if %2 {
      %c0_99 = arith.constant 0 : index
      %c0_100 = arith.constant 0 : index
      %229 = vector.load %arg1[%c0_99, %c0_100] : memref<16x16xf32, #tpu.memory_space<vmem>>, vector<16x16xf32>
      %230 = arith.truncf %229 : vector<16x16xf32> to vector<16x16xbf16>
      %c0_101 = arith.constant 0 : index
      %c0_102 = arith.constant 0 : index
      %231 = vector.load %arg3[%c0_101, %c0_102] : memref<16x32xbf16, #tpu.memory_space<vmem>>, vector<16x32xbf16>
      %cst_103 = arith.constant dense<0.000000e+00> : vector<16x32xf32>
      %232 = tpu.matmul %230, %231, %cst_103 {dimension_numbers = #tpu.dot_dimension_numbers<[1], [0], [0], [1], [0, 0, 1, 1], [], []>} : vector<16x16xbf16>, vector<16x32xbf16>, vector<16x32xf32> -> vector<16x32xf32>
      %c0_104 = arith.constant 0 : index
      %c0_105 = arith.constant 0 : index
      %233 = vector.load %arg2[%c0_104, %c0_105] : memref<16x32xf32, #tpu.memory_space<vmem>>, vector<16x32xf32>
      %234 = arith.addf %232, %233 : vector<16x32xf32>
      %c0_106 = arith.constant 0 : index
      %c0_107 = arith.constant 0 : index
      %235 = vector.load %arg13[%c0_106, %c0_107] : memref<16x32xf32, #tpu.memory_space<vmem>>, vector<16x32xf32>
      tpu.vector_store %arg13[%c0_106, %c0_107], %234 {strides = array<i32>} : memref<16x32xf32, #tpu.memory_space<vmem>>, vector<16x32xf32>,
    } else {
    }
    %c0 = arith.constant 0 : index
    %c0_1 = arith.constant 0 : index
    %3 = vector.load %arg13[%c0, %c0_1] : memref<16x32xf32, #tpu.memory_space<vmem>>, vector<16x32xf32>
    %c0_2 = arith.constant 0 : index
    %c0_3 = arith.constant 0 : index
    %c0_4 = arith.constant 0 : index
    %4 = vector.load %arg6[%c0_2, %c0_3, %c0_4] : memref<1x8x128xf32, #tpu.memory_space<vmem>>, vector<1x1x96xf32>
    %5 = vector.shape_cast %4 : vector<1x1x96xf32> to vector<1x96xf32>
    %c0_5 = arith.constant 0 : index
    %c1 = arith.constant 1 : index
    %c0_6 = arith.constant 0 : index
    %6 = vector.load %arg6[%c0_5, %c1, %c0_6] : memref<1x8x128xf32, #tpu.memory_space<vmem>>, vector<1x1x32xf32>
    %7 = vector.shape_cast %6 : vector<1x1x32xf32> to vector<1x32xf32>
    %c0_7 = arith.constant 0 : index
    %c2 = arith.constant 2 : index
    %c0_8 = arith.constant 0 : index
    %8 = vector.load %arg6[%c0_7, %c2, %c0_8] : memref<1x8x128xf32, #tpu.memory_space<vmem>>, vector<1x1x32xf32>
    %9 = vector.shape_cast %8 : vector<1x1x32xf32> to vector<1x32xf32>
    %c0_9 = arith.constant 0 : index
    %c3 = arith.constant 3 : index
    %c0_10 = arith.constant 0 : index
    %10 = vector.load %arg6[%c0_9, %c3, %c0_10] : memref<1x8x128xf32, #tpu.memory_space<vmem>>, vector<1x1x32xf32>
    %11 = vector.shape_cast %10 : vector<1x1x32xf32> to vector<1x32xf32>
    %c0_11 = arith.constant 0 : index
    %c4 = arith.constant 4 : index
    %c0_12 = arith.constant 0 : index
    %12 = vector.load %arg6[%c0_11, %c4, %c0_12] : memref<1x8x128xf32, #tpu.memory_space<vmem>>, vector<1x1x32xf32>
    %13 = vector.shape_cast %12 : vector<1x1x32xf32> to vector<1x32xf32>
    %c0_13 = arith.constant 0 : index
    %c5 = arith.constant 5 : index
    %c0_14 = arith.constant 0 : index
    %14 = vector.load %arg6[%c0_13, %c5, %c0_14] : memref<1x8x128xf32, #tpu.memory_space<vmem>>, vector<1x1x32xf32>
    %15 = vector.shape_cast %14 : vector<1x1x32xf32> to vector<1x32xf32>
    %c0_15 = arith.constant 0 : index
    %c6 = arith.constant 6 : index
    %c0_16 = arith.constant 0 : index
    %16 = vector.load %arg6[%c0_15, %c6, %c0_16] : memref<1x8x128xf32, #tpu.memory_space<vmem>>, vector<1x1x32xf32>
    %17 = vector.shape_cast %16 : vector<1x1x32xf32> to vector<1x32xf32>
    %18 = arith.truncf %3 : vector<16x32xf32> to vector<16x32xbf16>
    %c0_17 = arith.constant 0 : index
    %c0_18 = arith.constant 0 : index
    %c0_19 = arith.constant 0 : index
    %19 = vector.load %arg4[%c0_17, %c0_18, %c0_19] : memref<1x32x96xbf16, #tpu.memory_space<vmem>>, vector<1x32x96xbf16>
    %20 = vector.shape_cast %19 : vector<1x32x96xbf16> to vector<32x96xbf16>
    %cst = arith.constant dense<0.000000e+00> : vector<16x96xf32>
    %21 = tpu.matmul %18, %20, %cst {dimension_numbers = #tpu.dot_dimension_numbers<[1], [0], [0], [1], [0, 0, 1, 1], [], []>} : vector<16x32xbf16>, vector<32x96xbf16>, vector<16x96xf32> -> vector<16x96xf32>
    %22 = vector.broadcast %5 : vector<1x96xf32> to vector<16x96xf32>
    %23 = arith.addf %21, %22 : vector<16x96xf32>
    %24 = vector.extract_strided_slice %23 {offsets = [0, 0], sizes = [16, 8], strides = [1, 1]} : vector<16x96xf32> to vector<16x8xf32>
    %25 = vector.shape_cast %24 : vector<16x8xf32> to vector<2x8x8xf32>
    %26 = arith.truncf %25 : vector<2x8x8xf32> to vector<2x8x8xbf16>
    %27 = vector.extract_strided_slice %23 {offsets = [0, 32], sizes = [16, 8], strides = [1, 1]} : vector<16x96xf32> to vector<16x8xf32>
    %28 = vector.shape_cast %27 : vector<16x8xf32> to vector<2x8x8xf32>
    %29 = arith.truncf %28 : vector<2x8x8xf32> to vector<2x8x8xbf16>
    %30 = vector.extract_strided_slice %23 {offsets = [0, 64], sizes = [16, 8], strides = [1, 1]} : vector<16x96xf32> to vector<16x8xf32>
    %31 = vector.shape_cast %30 : vector<16x8xf32> to vector<2x8x8xf32>
    %32 = arith.truncf %31 : vector<2x8x8xf32> to vector<2x8x8xbf16>
    "tpu.trace_start"() <{level = 10 : i32, message = "bqd,bkd->bqk"}> : () -> ()
    %cst_20 = arith.constant dense<0.000000e+00> : vector<2x8x8xf32>
    %33 = tpu.matmul %26, %29, %cst_20 {dimension_numbers = #tpu.dot_dimension_numbers<[2], [2], [1], [1], [0, 0, 0, 1, 1, 1], [0], [0]>} : vector<2x8x8xbf16>, vector<2x8x8xbf16>, vector<2x8x8xf32> -> vector<2x8x8xf32>
    "tpu.trace_stop"() : () -> ()
    %cst_21 = arith.constant dense<0xFF800000> : vector<2x8xf32>
    %34 = vector.multi_reduction <maximumf>, %33, %cst_21 [2] : vector<2x8x8xf32> to vector<2x8xf32>
    %35 = vector.shape_cast %34 : vector<2x8xf32> to vector<2x8x1xf32>
    %36 = vector.broadcast %35 : vector<2x8x1xf32> to vector<2x8x8xf32>
    %37 = arith.subf %33, %36 : vector<2x8x8xf32>
    %38 = math.exp %37 : vector<2x8x8xf32>
    %cst_22 = arith.constant dense<0.000000e+00> : vector<2x8xf32>
    %39 = vector.multi_reduction <add>, %38, %cst_22 [2] : vector<2x8x8xf32> to vector<2x8xf32>
    %40 = vector.shape_cast %39 : vector<2x8xf32> to vector<2x8x1xf32>
    %41 = tpu.reciprocal %40 {approx = true} : vector<2x8x1xf32> -> vector<2x8x1xf32>
    %42 = vector.broadcast %41 : vector<2x8x1xf32> to vector<2x8x8xf32>
    %43 = arith.mulf %38, %42 : vector<2x8x8xf32>
    %44 = arith.truncf %43 : vector<2x8x8xf32> to vector<2x8x8xbf16>
    "tpu.trace_start"() <{level = 10 : i32, message = "bqk,bkd->bqd"}> : () -> ()
    %cst_23 = arith.constant dense<0.000000e+00> : vector<2x8x8xf32>
    %45 = tpu.matmul %44, %32, %cst_23 {dimension_numbers = #tpu.dot_dimension_numbers<[2], [1], [1], [2], [0, 0, 0, 1, 1, 2], [0], [0]>} : vector<2x8x8xbf16>, vector<2x8x8xbf16>, vector<2x8x8xf32> -> vector<2x8x8xf32>
    "tpu.trace_stop"() : () -> ()
    %46 = vector.shape_cast %45 : vector<2x8x8xf32> to vector<16x8xf32>
    %47 = vector.extract_strided_slice %23 {offsets = [0, 8], sizes = [16, 8], strides = [1, 1]} : vector<16x96xf32> to vector<16x8xf32>
    %48 = vector.shape_cast %47 : vector<16x8xf32> to vector<2x8x8xf32>
    %49 = arith.truncf %48 : vector<2x8x8xf32> to vector<2x8x8xbf16>
    %50 = vector.extract_strided_slice %23 {offsets = [0, 40], sizes = [16, 8], strides = [1, 1]} : vector<16x96xf32> to vector<16x8xf32>
    %51 = vector.shape_cast %50 : vector<16x8xf32> to vector<2x8x8xf32>
    %52 = arith.truncf %51 : vector<2x8x8xf32> to vector<2x8x8xbf16>
    %53 = vector.extract_strided_slice %23 {offsets = [0, 72], sizes = [16, 8], strides = [1, 1]} : vector<16x96xf32> to vector<16x8xf32>
    %54 = vector.shape_cast %53 : vector<16x8xf32> to vector<2x8x8xf32>
    %55 = arith.truncf %54 : vector<2x8x8xf32> to vector<2x8x8xbf16>
    "tpu.trace_start"() <{level = 10 : i32, message = "bqd,bkd->bqk"}> : () -> ()
    %cst_24 = arith.constant dense<0.000000e+00> : vector<2x8x8xf32>
    %56 = tpu.matmul %49, %52, %cst_24 {dimension_numbers = #tpu.dot_dimension_numbers<[2], [2], [1], [1], [0, 0, 0, 1, 1, 1], [0], [0]>} : vector<2x8x8xbf16>, vector<2x8x8xbf16>, vector<2x8x8xf32> -> vector<2x8x8xf32>
    "tpu.trace_stop"() : () -> ()
    %cst_25 = arith.constant dense<0xFF800000> : vector<2x8xf32>
    %57 = vector.multi_reduction <maximumf>, %56, %cst_25 [2] : vector<2x8x8xf32> to vector<2x8xf32>
    %58 = vector.shape_cast %57 : vector<2x8xf32> to vector<2x8x1xf32>
    %59 = vector.broadcast %58 : vector<2x8x1xf32> to vector<2x8x8xf32>
    %60 = arith.subf %56, %59 : vector<2x8x8xf32>
    %61 = math.exp %60 : vector<2x8x8xf32>
    %cst_26 = arith.constant dense<0.000000e+00> : vector<2x8xf32>
    %62 = vector.multi_reduction <add>, %61, %cst_26 [2] : vector<2x8x8xf32> to vector<2x8xf32>
    %63 = vector.shape_cast %62 : vector<2x8xf32> to vector<2x8x1xf32>
    %64 = tpu.reciprocal %63 {approx = true} : vector<2x8x1xf32> -> vector<2x8x1xf32>
    %65 = vector.broadcast %64 : vector<2x8x1xf32> to vector<2x8x8xf32>
    %66 = arith.mulf %61, %65 : vector<2x8x8xf32>
    %67 = arith.truncf %66 : vector<2x8x8xf32> to vector<2x8x8xbf16>
    "tpu.trace_start"() <{level = 10 : i32, message = "bqk,bkd->bqd"}> : () -> ()
    %cst_27 = arith.constant dense<0.000000e+00> : vector<2x8x8xf32>
    %68 = tpu.matmul %67, %55, %cst_27 {dimension_numbers = #tpu.dot_dimension_numbers<[2], [1], [1], [2], [0, 0, 0, 1, 1, 2], [0], [0]>} : vector<2x8x8xbf16>, vector<2x8x8xbf16>, vector<2x8x8xf32> -> vector<2x8x8xf32>
    "tpu.trace_stop"() : () -> ()
    %69 = vector.shape_cast %68 : vector<2x8x8xf32> to vector<16x8xf32>
    %70 = vector.extract_strided_slice %23 {offsets = [0, 16], sizes = [16, 8], strides = [1, 1]} : vector<16x96xf32> to vector<16x8xf32>
    %71 = vector.shape_cast %70 : vector<16x8xf32> to vector<2x8x8xf32>
    %72 = arith.truncf %71 : vector<2x8x8xf32> to vector<2x8x8xbf16>
    %73 = vector.extract_strided_slice %23 {offsets = [0, 48], sizes = [16, 8], strides = [1, 1]} : vector<16x96xf32> to vector<16x8xf32>
    %74 = vector.shape_cast %73 : vector<16x8xf32> to vector<2x8x8xf32>
    %75 = arith.truncf %74 : vector<2x8x8xf32> to vector<2x8x8xbf16>
    %76 = vector.extract_strided_slice %23 {offsets = [0, 80], sizes = [16, 8], strides = [1, 1]} : vector<16x96xf32> to vector<16x8xf32>
    %77 = vector.shape_cast %76 : vector<16x8xf32> to vector<2x8x8xf32>
    %78 = arith.truncf %77 : vector<2x8x8xf32> to vector<2x8x8xbf16>
    "tpu.trace_start"() <{level = 10 : i32, message = "bqd,bkd->bqk"}> : () -> ()
    %cst_28 = arith.constant dense<0.000000e+00> : vector<2x8x8xf32>
    %79 = tpu.matmul %72, %75, %cst_28 {dimension_numbers = #tpu.dot_dimension_numbers<[2], [2], [1], [1], [0, 0, 0, 1, 1, 1], [0], [0]>} : vector<2x8x8xbf16>, vector<2x8x8xbf16>, vector<2x8x8xf32> -> vector<2x8x8xf32>
    "tpu.trace_stop"() : () -> ()
    %cst_29 = arith.constant dense<0xFF800000> : vector<2x8xf32>
    %80 = vector.multi_reduction <maximumf>, %79, %cst_29 [2] : vector<2x8x8xf32> to vector<2x8xf32>
    %81 = vector.shape_cast %80 : vector<2x8xf32> to vector<2x8x1xf32>
    %82 = vector.broadcast %81 : vector<2x8x1xf32> to vector<2x8x8xf32>
    %83 = arith.subf %79, %82 : vector<2x8x8xf32>
    %84 = math.exp %83 : vector<2x8x8xf32>
    %cst_30 = arith.constant dense<0.000000e+00> : vector<2x8xf32>
    %85 = vector.multi_reduction <add>, %84, %cst_30 [2] : vector<2x8x8xf32> to vector<2x8xf32>
    %86 = vector.shape_cast %85 : vector<2x8xf32> to vector<2x8x1xf32>
    %87 = tpu.reciprocal %86 {approx = true} : vector<2x8x1xf32> -> vector<2x8x1xf32>
    %88 = vector.broadcast %87 : vector<2x8x1xf32> to vector<2x8x8xf32>
    %89 = arith.mulf %84, %88 : vector<2x8x8xf32>
    %90 = arith.truncf %89 : vector<2x8x8xf32> to vector<2x8x8xbf16>
    "tpu.trace_start"() <{level = 10 : i32, message = "bqk,bkd->bqd"}> : () -> ()
    %cst_31 = arith.constant dense<0.000000e+00> : vector<2x8x8xf32>
    %91 = tpu.matmul %90, %78, %cst_31 {dimension_numbers = #tpu.dot_dimension_numbers<[2], [1], [1], [2], [0, 0, 0, 1, 1, 2], [0], [0]>} : vector<2x8x8xbf16>, vector<2x8x8xbf16>, vector<2x8x8xf32> -> vector<2x8x8xf32>
    "tpu.trace_stop"() : () -> ()
    %92 = vector.shape_cast %91 : vector<2x8x8xf32> to vector<16x8xf32>
    %93 = vector.extract_strided_slice %23 {offsets = [0, 24], sizes = [16, 8], strides = [1, 1]} : vector<16x96xf32> to vector<16x8xf32>
    %94 = vector.shape_cast %93 : vector<16x8xf32> to vector<2x8x8xf32>
    %95 = arith.truncf %94 : vector<2x8x8xf32> to vector<2x8x8xbf16>
    %96 = vector.extract_strided_slice %23 {offsets = [0, 56], sizes = [16, 8], strides = [1, 1]} : vector<16x96xf32> to vector<16x8xf32>
    %97 = vector.shape_cast %96 : vector<16x8xf32> to vector<2x8x8xf32>
    %98 = arith.truncf %97 : vector<2x8x8xf32> to vector<2x8x8xbf16>
    %99 = vector.extract_strided_slice %23 {offsets = [0, 88], sizes = [16, 8], strides = [1, 1]} : vector<16x96xf32> to vector<16x8xf32>
    %100 = vector.shape_cast %99 : vector<16x8xf32> to vector<2x8x8xf32>
    %101 = arith.truncf %100 : vector<2x8x8xf32> to vector<2x8x8xbf16>
    "tpu.trace_start"() <{level = 10 : i32, message = "bqd,bkd->bqk"}> : () -> ()
    %cst_32 = arith.constant dense<0.000000e+00> : vector<2x8x8xf32>
    %102 = tpu.matmul %95, %98, %cst_32 {dimension_numbers = #tpu.dot_dimension_numbers<[2], [2], [1], [1], [0, 0, 0, 1, 1, 1], [0], [0]>} : vector<2x8x8xbf16>, vector<2x8x8xbf16>, vector<2x8x8xf32> -> vector<2x8x8xf32>
    "tpu.trace_stop"() : () -> ()
    %cst_33 = arith.constant dense<0xFF800000> : vector<2x8xf32>
    %103 = vector.multi_reduction <maximumf>, %102, %cst_33 [2] : vector<2x8x8xf32> to vector<2x8xf32>
    %104 = vector.shape_cast %103 : vector<2x8xf32> to vector<2x8x1xf32>
    %105 = vector.broadcast %104 : vector<2x8x1xf32> to vector<2x8x8xf32>
    %106 = arith.subf %102, %105 : vector<2x8x8xf32>
    %107 = math.exp %106 : vector<2x8x8xf32>
    %cst_34 = arith.constant dense<0.000000e+00> : vector<2x8xf32>
    %108 = vector.multi_reduction <add>, %107, %cst_34 [2] : vector<2x8x8xf32> to vector<2x8xf32>
    %109 = vector.shape_cast %108 : vector<2x8xf32> to vector<2x8x1xf32>
    %110 = tpu.reciprocal %109 {approx = true} : vector<2x8x1xf32> -> vector<2x8x1xf32>
    %111 = vector.broadcast %110 : vector<2x8x1xf32> to vector<2x8x8xf32>
    %112 = arith.mulf %107, %111 : vector<2x8x8xf32>
    %113 = arith.truncf %112 : vector<2x8x8xf32> to vector<2x8x8xbf16>
    "tpu.trace_start"() <{level = 10 : i32, message = "bqk,bkd->bqd"}> : () -> ()
    %cst_35 = arith.constant dense<0.000000e+00> : vector<2x8x8xf32>
    %114 = tpu.matmul %113, %101, %cst_35 {dimension_numbers = #tpu.dot_dimension_numbers<[2], [1], [1], [2], [0, 0, 0, 1, 1, 2], [0], [0]>} : vector<2x8x8xbf16>, vector<2x8x8xbf16>, vector<2x8x8xf32> -> vector<2x8x8xf32>
    "tpu.trace_stop"() : () -> ()
    %115 = vector.shape_cast %114 : vector<2x8x8xf32> to vector<16x8xf32>
    %116 = tpu.concatenate %46, %69, %92, %115 in 1 : vector<16x8xf32>, vector<16x8xf32>, vector<16x8xf32>, vector<16x8xf32> -> vector<16x32xf32>
    %117 = arith.truncf %116 : vector<16x32xf32> to vector<16x32xbf16>
    %c0_36 = arith.constant 0 : index
    %c0_37 = arith.constant 0 : index
    %c0_38 = arith.constant 0 : index
    %118 = vector.load %arg5[%c0_36, %c0_37, %c0_38] : memref<1x32x32xbf16, #tpu.memory_space<vmem>>, vector<1x32x32xbf16>
    %119 = vector.shape_cast %118 : vector<1x32x32xbf16> to vector<32x32xbf16>
    %cst_39 = arith.constant dense<0.000000e+00> : vector<16x32xf32>
    %120 = tpu.matmul %117, %119, %cst_39 {dimension_numbers = #tpu.dot_dimension_numbers<[1], [0], [0], [1], [0, 0, 1, 1], [], []>} : vector<16x32xbf16>, vector<32x32xbf16>, vector<16x32xf32> -> vector<16x32xf32>
    %121 = vector.broadcast %7 : vector<1x32xf32> to vector<16x32xf32>
    %122 = arith.addf %120, %121 : vector<16x32xf32>
    %123 = arith.addf %3, %122 : vector<16x32xf32>
    %cst_40 = arith.constant dense<0.000000e+00> : vector<16xf32>
    %124 = vector.multi_reduction <add>, %123, %cst_40 [1] : vector<16x32xf32> to vector<16xf32>
    %125 = vector.shape_cast %124 : vector<16xf32> to vector<16x1xf32>
    %cst_41 = arith.constant 3.200000e+01 : f32
    %126 = vector.broadcast %cst_41 : f32 to vector<16x1xf32>
    %127 = arith.divf %125, %126 : vector<16x1xf32>
    %128 = vector.broadcast %127 : vector<16x1xf32> to vector<16x32xf32>
    %129 = arith.subf %123, %128 : vector<16x32xf32>
    %130 = arith.mulf %129, %129 : vector<16x32xf32>
    %cst_42 = arith.constant dense<0.000000e+00> : vector<16xf32>
    %131 = vector.multi_reduction <add>, %130, %cst_42 [1] : vector<16x32xf32> to vector<16xf32>
    %132 = vector.shape_cast %131 : vector<16xf32> to vector<16x1xf32>
    %cst_43 = arith.constant 3.200000e+01 : f32
    %133 = vector.broadcast %cst_43 : f32 to vector<16x1xf32>
    %134 = arith.divf %132, %133 : vector<16x1xf32>
    %cst_44 = arith.constant 9.99999974E-6 : f32
    %135 = vector.broadcast %cst_44 : f32 to vector<16x1xf32>
    %136 = arith.addf %134, %135 : vector<16x1xf32>
    %137 = math.rsqrt %136 : vector<16x1xf32>
    %138 = vector.broadcast %137 : vector<16x1xf32> to vector<16x32xf32>
    %139 = arith.mulf %129, %138 : vector<16x32xf32>
    %140 = vector.broadcast %9 : vector<1x32xf32> to vector<16x32xf32>
    %141 = arith.mulf %139, %140 : vector<16x32xf32>
    %142 = vector.broadcast %11 : vector<1x32xf32> to vector<16x32xf32>
    %143 = arith.addf %141, %142 : vector<16x32xf32>
    %144 = arith.truncf %143 : vector<16x32xf32> to vector<16x32xbf16>
    %cst_45 = arith.constant 0.000000e+00 : f32
    %145 = vector.broadcast %cst_45 : f32 to vector<16x32xf32>
    %c0_46 = arith.constant 0 : index
    %c0_47 = arith.constant 0 : index
    %c0_48 = arith.constant 0 : index
    %146 = vector.load %arg7[%c0_46, %c0_47, %c0_48] : memref<1x32x2048xbf16, #tpu.memory_space<vmem>>, vector<1x32x512xbf16>
    %147 = vector.shape_cast %146 : vector<1x32x512xbf16> to vector<32x512xbf16>
    %cst_49 = arith.constant dense<0.000000e+00> : vector<16x512xf32>
    %148 = tpu.matmul %144, %147, %cst_49 {dimension_numbers = #tpu.dot_dimension_numbers<[1], [0], [0], [1], [0, 0, 1, 1], [], []>} : vector<16x32xbf16>, vector<32x512xbf16>, vector<16x512xf32> -> vector<16x512xf32>
    %c0_50 = arith.constant 0 : index
    %c0_51 = arith.constant 0 : index
    %c0_52 = arith.constant 0 : index
    %149 = vector.load %arg8[%c0_50, %c0_51, %c0_52] : memref<1x1x2048xf32, #tpu.memory_space<vmem>>, vector<1x1x512xf32>
    %150 = vector.shape_cast %149 : vector<1x1x512xf32> to vector<1x512xf32>
    %151 = vector.broadcast %150 : vector<1x512xf32> to vector<16x512xf32>
    %152 = arith.addf %148, %151 : vector<16x512xf32>
    %cst_53 = arith.constant 0.000000e+00 : f32
    %153 = vector.broadcast %cst_53 : f32 to vector<16x512xf32>
    %154 = arith.maximumf %152, %153 : vector<16x512xf32>
    %155 = arith.truncf %154 : vector<16x512xf32> to vector<16x512xbf16>
    %c0_54 = arith.constant 0 : index
    %c0_55 = arith.constant 0 : index
    %c0_56 = arith.constant 0 : index
    %156 = vector.load %arg9[%c0_54, %c0_55, %c0_56] : memref<1x2048x32xbf16, #tpu.memory_space<vmem>>, vector<1x512x32xbf16>
    %157 = vector.shape_cast %156 : vector<1x512x32xbf16> to vector<512x32xbf16>
    %cst_57 = arith.constant dense<0.000000e+00> : vector<16x32xf32>
    %158 = tpu.matmul %155, %157, %cst_57 {dimension_numbers = #tpu.dot_dimension_numbers<[1], [0], [0], [1], [0, 0, 1, 1], [], []>} : vector<16x512xbf16>, vector<512x32xbf16>, vector<16x32xf32> -> vector<16x32xf32>
    %159 = arith.addf %145, %158 : vector<16x32xf32>
    %c0_58 = arith.constant 0 : index
    %c0_59 = arith.constant 0 : index
    %c512 = arith.constant 512 : index
    %160 = vector.load %arg7[%c0_58, %c0_59, %c512] : memref<1x32x2048xbf16, #tpu.memory_space<vmem>>, vector<1x32x512xbf16>
    %161 = vector.shape_cast %160 : vector<1x32x512xbf16> to vector<32x512xbf16>
    %cst_60 = arith.constant dense<0.000000e+00> : vector<16x512xf32>
    %162 = tpu.matmul %144, %161, %cst_60 {dimension_numbers = #tpu.dot_dimension_numbers<[1], [0], [0], [1], [0, 0, 1, 1], [], []>} : vector<16x32xbf16>, vector<32x512xbf16>, vector<16x512xf32> -> vector<16x512xf32>
    %c0_61 = arith.constant 0 : index
    %c0_62 = arith.constant 0 : index
    %c512_63 = arith.constant 512 : index
    %163 = vector.load %arg8[%c0_61, %c0_62, %c512_63] : memref<1x1x2048xf32, #tpu.memory_space<vmem>>, vector<1x1x512xf32>
    %164 = vector.shape_cast %163 : vector<1x1x512xf32> to vector<1x512xf32>
    %165 = vector.broadcast %164 : vector<1x512xf32> to vector<16x512xf32>
    %166 = arith.addf %162, %165 : vector<16x512xf32>
    %cst_64 = arith.constant 0.000000e+00 : f32
    %167 = vector.broadcast %cst_64 : f32 to vector<16x512xf32>
    %168 = arith.maximumf %166, %167 : vector<16x512xf32>
    %169 = arith.truncf %168 : vector<16x512xf32> to vector<16x512xbf16>
    %c0_65 = arith.constant 0 : index
    %c512_66 = arith.constant 512 : index
    %c0_67 = arith.constant 0 : index
    %170 = vector.load %arg9[%c0_65, %c512_66, %c0_67] : memref<1x2048x32xbf16, #tpu.memory_space<vmem>>, vector<1x512x32xbf16>
    %171 = vector.shape_cast %170 : vector<1x512x32xbf16> to vector<512x32xbf16>
    %cst_68 = arith.constant dense<0.000000e+00> : vector<16x32xf32>
    %172 = tpu.matmul %169, %171, %cst_68 {dimension_numbers = #tpu.dot_dimension_numbers<[1], [0], [0], [1], [0, 0, 1, 1], [], []>} : vector<16x512xbf16>, vector<512x32xbf16>, vector<16x32xf32> -> vector<16x32xf32>
    %173 = arith.addf %159, %172 : vector<16x32xf32>
    %c0_69 = arith.constant 0 : index
    %c0_70 = arith.constant 0 : index
    %c1024 = arith.constant 1024 : index
    %174 = vector.load %arg7[%c0_69, %c0_70, %c1024] : memref<1x32x2048xbf16, #tpu.memory_space<vmem>>, vector<1x32x512xbf16>
    %175 = vector.shape_cast %174 : vector<1x32x512xbf16> to vector<32x512xbf16>
    %cst_71 = arith.constant dense<0.000000e+00> : vector<16x512xf32>
    %176 = tpu.matmul %144, %175, %cst_71 {dimension_numbers = #tpu.dot_dimension_numbers<[1], [0], [0], [1], [0, 0, 1, 1], [], []>} : vector<16x32xbf16>, vector<32x512xbf16>, vector<16x512xf32> -> vector<16x512xf32>
    %c0_72 = arith.constant 0 : index
    %c0_73 = arith.constant 0 : index
    %c1024_74 = arith.constant 1024 : index
    %177 = vector.load %arg8[%c0_72, %c0_73, %c1024_74] : memref<1x1x2048xf32, #tpu.memory_space<vmem>>, vector<1x1x512xf32>
    %178 = vector.shape_cast %177 : vector<1x1x512xf32> to vector<1x512xf32>
    %179 = vector.broadcast %178 : vector<1x512xf32> to vector<16x512xf32>
    %180 = arith.addf %176, %179 : vector<16x512xf32>
    %cst_75 = arith.constant 0.000000e+00 : f32
    %181 = vector.broadcast %cst_75 : f32 to vector<16x512xf32>
    %182 = arith.maximumf %180, %181 : vector<16x512xf32>
    %183 = arith.truncf %182 : vector<16x512xf32> to vector<16x512xbf16>
    %c0_76 = arith.constant 0 : index
    %c1024_77 = arith.constant 1024 : index
    %c0_78 = arith.constant 0 : index
    %184 = vector.load %arg9[%c0_76, %c1024_77, %c0_78] : memref<1x2048x32xbf16, #tpu.memory_space<vmem>>, vector<1x512x32xbf16>
    %185 = vector.shape_cast %184 : vector<1x512x32xbf16> to vector<512x32xbf16>
    %cst_79 = arith.constant dense<0.000000e+00> : vector<16x32xf32>
    %186 = tpu.matmul %183, %185, %cst_79 {dimension_numbers = #tpu.dot_dimension_numbers<[1], [0], [0], [1], [0, 0, 1, 1], [], []>} : vector<16x512xbf16>, vector<512x32xbf16>, vector<16x32xf32> -> vector<16x32xf32>
    %187 = arith.addf %173, %186 : vector<16x32xf32>
    %c0_80 = arith.constant 0 : index
    %c0_81 = arith.constant 0 : index
    %c1536 = arith.constant 1536 : index
    %188 = vector.load %arg7[%c0_80, %c0_81, %c1536] : memref<1x32x2048xbf16, #tpu.memory_space<vmem>>, vector<1x32x512xbf16>
    %189 = vector.shape_cast %188 : vector<1x32x512xbf16> to vector<32x512xbf16>
    %cst_82 = arith.constant dense<0.000000e+00> : vector<16x512xf32>
    %190 = tpu.matmul %144, %189, %cst_82 {dimension_numbers = #tpu.dot_dimension_numbers<[1], [0], [0], [1], [0, 0, 1, 1], [], []>} : vector<16x32xbf16>, vector<32x512xbf16>, vector<16x512xf32> -> vector<16x512xf32>
    %c0_83 = arith.constant 0 : index
    %c0_84 = arith.constant 0 : index
    %c1536_85 = arith.constant 1536 : index
    %191 = vector.load %arg8[%c0_83, %c0_84, %c1536_85] : memref<1x1x2048xf32, #tpu.memory_space<vmem>>, vector<1x1x512xf32>
    %192 = vector.shape_cast %191 : vector<1x1x512xf32> to vector<1x512xf32>
    %193 = vector.broadcast %192 : vector<1x512xf32> to vector<16x512xf32>
    %194 = arith.addf %190, %193 : vector<16x512xf32>
    %cst_86 = arith.constant 0.000000e+00 : f32
    %195 = vector.broadcast %cst_86 : f32 to vector<16x512xf32>
    %196 = arith.maximumf %194, %195 : vector<16x512xf32>
    %197 = arith.truncf %196 : vector<16x512xf32> to vector<16x512xbf16>
    %c0_87 = arith.constant 0 : index
    %c1536_88 = arith.constant 1536 : index
    %c0_89 = arith.constant 0 : index
    %198 = vector.load %arg9[%c0_87, %c1536_88, %c0_89] : memref<1x2048x32xbf16, #tpu.memory_space<vmem>>, vector<1x512x32xbf16>
    %199 = vector.shape_cast %198 : vector<1x512x32xbf16> to vector<512x32xbf16>
    %cst_90 = arith.constant dense<0.000000e+00> : vector<16x32xf32>
    %200 = tpu.matmul %197, %199, %cst_90 {dimension_numbers = #tpu.dot_dimension_numbers<[1], [0], [0], [1], [0, 0, 1, 1], [], []>} : vector<16x512xbf16>, vector<512x32xbf16>, vector<16x32xf32> -> vector<16x32xf32>
    %201 = arith.addf %187, %200 : vector<16x32xf32>
    %202 = vector.broadcast %17 : vector<1x32xf32> to vector<16x32xf32>
    %203 = arith.addf %201, %202 : vector<16x32xf32>
    %204 = arith.addf %143, %203 : vector<16x32xf32>
    %cst_91 = arith.constant dense<0.000000e+00> : vector<16xf32>
    %205 = vector.multi_reduction <add>, %204, %cst_91 [1] : vector<16x32xf32> to vector<16xf32>
    %206 = vector.shape_cast %205 : vector<16xf32> to vector<16x1xf32>
    %cst_92 = arith.constant 3.200000e+01 : f32
    %207 = vector.broadcast %cst_92 : f32 to vector<16x1xf32>
    %208 = arith.divf %206, %207 : vector<16x1xf32>
    %209 = vector.broadcast %208 : vector<16x1xf32> to vector<16x32xf32>
    %210 = arith.subf %204, %209 : vector<16x32xf32>
    %211 = arith.mulf %210, %210 : vector<16x32xf32>
    %cst_93 = arith.constant dense<0.000000e+00> : vector<16xf32>
    %212 = vector.multi_reduction <add>, %211, %cst_93 [1] : vector<16x32xf32> to vector<16xf32>
    %213 = vector.shape_cast %212 : vector<16xf32> to vector<16x1xf32>
    %cst_94 = arith.constant 3.200000e+01 : f32
    %214 = vector.broadcast %cst_94 : f32 to vector<16x1xf32>
    %215 = arith.divf %213, %214 : vector<16x1xf32>
    %cst_95 = arith.constant 9.99999974E-6 : f32
    %216 = vector.broadcast %cst_95 : f32 to vector<16x1xf32>
    %217 = arith.addf %215, %216 : vector<16x1xf32>
    %218 = math.rsqrt %217 : vector<16x1xf32>
    %219 = vector.broadcast %218 : vector<16x1xf32> to vector<16x32xf32>
    %220 = arith.mulf %210, %219 : vector<16x32xf32>
    %221 = vector.broadcast %13 : vector<1x32xf32> to vector<16x32xf32>
    %222 = arith.mulf %220, %221 : vector<16x32xf32>
    %223 = vector.broadcast %15 : vector<1x32xf32> to vector<16x32xf32>
    %224 = arith.addf %222, %223 : vector<16x32xf32>
    %c0_96 = arith.constant 0 : index
    %c0_97 = arith.constant 0 : index
    %225 = vector.load %arg13[%c0_96, %c0_97] : memref<16x32xf32, #tpu.memory_space<vmem>>, vector<16x32xf32>
    tpu.vector_store %arg13[%c0_96, %c0_97], %224 {strides = array<i32>} : memref<16x32xf32, #tpu.memory_space<vmem>>, vector<16x32xf32>,
    %c1_i32 = arith.constant 1 : i32
    %226 = arith.cmpi eq, %arg0, %c1_i32 : i32
    %227 = arith.extui %226 : i1 to i32
    %c0_i32_98 = arith.constant 0 : i32
    %228 = arith.cmpi ne, %227, %c0_i32_98 : i32
    scf.if %228 {
      %229 = vector.shape_cast %224 : vector<16x32xf32> to vector<2x8x32xf32>
      %cst_99 = arith.constant dense<0.000000e+00> : vector<2x32xf32>
      %230 = vector.multi_reduction <add>, %229, %cst_99 [1] : vector<2x8x32xf32> to vector<2x32xf32>
      %cst_100 = arith.constant 1.250000e-01 : f32
      %231 = vector.broadcast %cst_100 : f32 to vector<2x32xf32>
      %232 = arith.mulf %230, %231 : vector<2x32xf32>
      %233 = arith.truncf %232 : vector<2x32xf32> to vector<2x32xbf16>
      %c0_101 = arith.constant 0 : index
      %c0_102 = arith.constant 0 : index
      %234 = vector.load %arg10[%c0_101, %c0_102] : memref<32x8xbf16, #tpu.memory_space<vmem>>, vector<32x8xbf16>
      %cst_103 = arith.constant dense<0.000000e+00> : vector<2x8xf32>
      %235 = tpu.matmul %233, %234, %cst_103 {dimension_numbers = #tpu.dot_dimension_numbers<[1], [0], [0], [1], [0, 0, 1, 1], [], []>} : vector<2x32xbf16>, vector<32x8xbf16>, vector<2x8xf32> -> vector<2x8xf32>
      %c0_104 = arith.constant 0 : index
      %c0_105 = arith.constant 0 : index
      %236 = vector.load %arg11[%c0_104, %c0_105] : memref<1x8xf32, #tpu.memory_space<vmem>>, vector<1x8xf32>
      %237 = vector.broadcast %236 : vector<1x8xf32> to vector<2x8xf32>
      %238 = arith.addf %235, %237 : vector<2x8xf32>
      %c0_106 = arith.constant 0 : index
      %c0_107 = arith.constant 0 : index
      %239 = vector.load %arg12[%c0_106, %c0_107] : memref<2x8xf32, #tpu.memory_space<vmem>>, vector<2x8xf32>
      tpu.vector_store %arg12[%c0_106, %c0_107], %238 {strides = array<i32>} : memref<2x8xf32, #tpu.memory_space<vmem>>, vector<2x8xf32>,
    } else {
    }
    return
  }
  func.func @transform_0(%arg0: i32) -> (i32, i32) {
    %c0_i32 = arith.constant 0 : i32
    %c0_i32_0 = arith.constant 0 : i32
    %c0_i32_1 = arith.constant 0 : i32
    return %c0_i32, %c0_i32_0 : i32, i32
  }
  func.func @transform_1(%arg0: i32) -> (i32, i32) {
    %c0_i32 = arith.constant 0 : i32
    %c0_i32_0 = arith.constant 0 : i32
    %c0_i32_1 = arith.constant 0 : i32
    return %c0_i32, %c0_i32_0 : i32, i32
  }
  func.func @transform_2(%arg0: i32) -> (i32, i32) {
    %c0_i32 = arith.constant 0 : i32
    %c0_i32_0 = arith.constant 0 : i32
    %c0_i32_1 = arith.constant 0 : i32
    return %c0_i32, %c0_i32_0 : i32, i32
  }
  func.func @transform_3(%arg0: i32) -> (i32, i32, i32) {
    %c0_i32 = arith.constant 0 : i32
    %c0_i32_0 = arith.constant 0 : i32
    %c0_i32_1 = arith.constant 0 : i32
    return %arg0, %c0_i32, %c0_i32_0 : i32, i32, i32
  }
  func.func @transform_4(%arg0: i32) -> (i32, i32, i32) {
    %c0_i32 = arith.constant 0 : i32
    %c0_i32_0 = arith.constant 0 : i32
    %c0_i32_1 = arith.constant 0 : i32
    return %arg0, %c0_i32, %c0_i32_0 : i32, i32, i32
  }
  func.func @transform_5(%arg0: i32) -> (i32, i32, i32) {
    %c0_i32 = arith.constant 0 : i32
    %c0_i32_0 = arith.constant 0 : i32
    %c0_i32_1 = arith.constant 0 : i32
    return %arg0, %c0_i32, %c0_i32_0 : i32, i32, i32
  }
  func.func @transform_6(%arg0: i32) -> (i32, i32, i32) {
    %c0_i32 = arith.constant 0 : i32
    %c0_i32_0 = arith.constant 0 : i32
    %c0_i32_1 = arith.constant 0 : i32
    return %arg0, %c0_i32, %c0_i32_0 : i32, i32, i32
  }
  func.func @transform_7(%arg0: i32) -> (i32, i32, i32) {
    %c0_i32 = arith.constant 0 : i32
    %c0_i32_0 = arith.constant 0 : i32
    %c0_i32_1 = arith.constant 0 : i32
    return %arg0, %c0_i32, %c0_i32_0 : i32, i32, i32
  }
  func.func @transform_8(%arg0: i32) -> (i32, i32, i32) {
    %c0_i32 = arith.constant 0 : i32
    %c0_i32_0 = arith.constant 0 : i32
    %c0_i32_1 = arith.constant 0 : i32
    return %arg0, %c0_i32, %c0_i32_0 : i32, i32, i32
  }
  func.func @transform_9(%arg0: i32) -> (i32, i32) {
    %c0_i32 = arith.constant 0 : i32
    %c0_i32_0 = arith.constant 0 : i32
    %c0_i32_1 = arith.constant 0 : i32
    return %c0_i32, %c0_i32_0 : i32, i32
  }
  func.func @transform_10(%arg0: i32) -> (i32, i32) {
    %c0_i32 = arith.constant 0 : i32
    %c0_i32_0 = arith.constant 0 : i32
    %c0_i32_1 = arith.constant 0 : i32
    return %c0_i32, %c0_i32_0 : i32, i32
  }
  func.func @transform_11(%arg0: i32) -> (i32, i32) {
    %c0_i32 = arith.constant 0 : i32
    %c0_i32_0 = arith.constant 0 : i32
    %c0_i32_1 = arith.constant 0 : i32
    return %c0_i32, %c0_i32_0 : i32, i32
  }
}

</mosaic_0001>

<bundles_post_ra>
// kernel: forward.1
= control target key start
LH: loop header
LB: loop body
LE: loop exit
PB: predicated region body
PF: predicated region fallthrough
CT: control target
= control target key end

     0   :  { %s4735_s0 = inlined_call_operand.vmem [shape: f32[16,16], index: 0, kind: input, shape index: {}]   ;;  %s4736_s1 = inlined_call_operand.vmem [shape: f32[16,32], index: 1, kind: input, shape index: {}]   ;;  %s4737_s2 = inlined_call_operand.vmem [shape: bf16[16,32], index: 2, kind: input, shape index: {}]   ;;  %s4738_s3 = inlined_call_operand.vmem [shape: bf16[2,32,96], index: 3, kind: input, shape index: {}]   ;;  %s4739_s4 = inlined_call_operand.vmem [shape: bf16[2,32,32], index: 4, kind: input, shape index: {}]   ;;  %s4740_s5 = inlined_call_operand.vmem [shape: f32[2,8,128], index: 5, kind: input, shape index: {}]   ;;  %s4741_s6 = inlined_call_operand.vmem [shape: bf16[2,32,2048], index: 6, kind: input, shape index: {}]   ;;  %s4742_s7 = inlined_call_operand.vmem [shape: f32[2,1,2048], index: 7, kind: input, shape index: {}]   ;;  %s4743_s8 = inlined_call_operand.vmem [shape: bf16[2,2048,32], index: 8, kind: input, shape index: {}]   ;;  %s4744_s9 = inlined_call_operand.vmem [shape: bf16[32,8], index: 9, kind: input, shape index: {}]   ;;  %s4745_s10 = inlined_call_operand.vmem [shape: f32[1,8], index: 10, kind: input, shape index: {}]   ;;  %s4746_s11 = inlined_call_operand.hbm [shape: f32[2,8], index: 11, kind: output, shape index: {}]  }
   0x1   :  { %4748 = sst [smem:[#allocation7_spill]] %s4738_s3 }
   0x2   :  { %16 = vsyncpa [#allocation4], 0  ;;  %s4229_s17 = smov 0  }
   0x3 LB: > { %4749 = sst [smem:[#allocation6_spill]] %s4151_s17  ;;  %s4235_s18 = sadd.s32 4294967295, %s4151_s17   ;;  %s4151_s17 = sphi %s4229_s17, %s22_s17  }
   0x4   : > { %p3126_p0 = scmp.ge.s32.totalorder %s4151_s17, 1  ;;  %p381_p1 = scmp.lt.s32.totalorder %s4151_s17, 3 }
   0x6   : > { %p382_p2 = pnand %p3126_p0, %p381_p1 }
   0x7   : > { %p439_p3 = scmp.lt.s32.totalorder (!%p382_p2), %s4235_s18, 1  ;;  %s4750_s3 = sld [smem:[#allocation7_spill]] (!%p382_p2) }
   0x8   : > { %385 = sbr.rel (%p382_p2) target bundleno = 2658 (0xa62), region = 64  ;;  %p3137_p4 = scmp.ne.s32.totalorder (!%p382_p2), %s4235_s18, 0 }
   0xd   : > { %s440_s19 = scalar_select %p439_p3, %s4235_s18, 1 }
   0xf   : > { %s3847_s20 = sshll.u32 %s440_s19, 4  ;;  %s3131_s21 = sshll.u32 %s440_s19, 3 }
  0x10   : > { %s443_s24 = scalar_lea.vmem %s4750_s3, %s3847_s20  ;;  %s4247_s27 = scalar_lea.vmem %s4739_s4, %s3847_s20 }
  0x11   : > { %s4252_s30 = scalar_lea.vmem %s4740_s5, %s3131_s21  ;;  %s3849_s12 = sshll.u32 %s440_s19, 8 }
  0x12   : > { %s4257_s15 = scalar_lea.vmem %s4741_s6, %s3849_s12  ;;  %s4262_s22 = scalar_lea.vmem %s4742_s7, %s3847_s20 }
  0x13   : > { %s3850_s23 = sshll.u32 %s440_s19, 10  ;;  %471 = sbr.rel (%p3137_p4) target bundleno = 165 (0xa5), region = 68 }
  0x14   : > { %s4267_s3 = scalar_lea.vmem %s4743_s8, %s3850_s23 }
  0x18   : > { %v3851_v0 = vld [vmem:[%s4737_s2] sm:$0xff]  ;;  %v473_v2 = vld [vmem:[%s4735_s0 + $0x8] sm:$0xff]  ;;  %vm485_vm0 = vcmask 130048   ;;  %vm503_vm1 = vcmask 261120  }
  0x19   : > { %v472_v1 = vld [vmem:[%s4735_s0] sm:$0xff]  ;;  %496 = vmatpush.bf16.msra.mxu0 %v3851_v0  ;;  %v478_v7 = vld [vmem:[%s4736_s1 + $0x8] sm:$0xff] }
  0x1a   : > { %v474_v3 = vpack.c.bf16 %v473_v2, %v472_v1  ;;  %v477_v4 = vld [vmem:[%s4736_s1] sm:$0xff] }
  0x1c   : > { %3142 = vmatmul.msk.bf16.vlgmr.msra.gmra.mxu0 %vm485_vm0, %v474_v3 }
  0x99   : > { %v498_v5 = vpop.f32.mrf.mxu0 }
  0x9a   : > { %v499_v6 = vadd.f32 %v498_v5, %v477_v4 }
  0x9c   : > { %504 = vst.msk [vmem:[#allocation2] sm:$0xff] %vm503_vm1, %v499_v6 }
  0xa1   : > { %v500_v8 = vpop.f32.mrf.mxu0 }
  0xa2   : > { %v501_v9 = vadd.f32 %v500_v8, %v478_v7 }
  0xa4   : > { %505 = vst.msk [vmem:[#allocation2 + $0x8] sm:$0xff] %vm503_vm1, %v501_v9 }
  0xa5 PF: > { %v3853_v10 = vld [vmem:[%s443_s24 + $0x8] sm:$0xff]  ;;  %v3852_v11 = vld [vmem:[%s443_s24] sm:$0xff]  ;;  %vm533_vm2 = vcmask 261120   ;;  %s4153_s24 = smov 120   ;;  %s4154_s23 = smov 88   ;;  %vm558_vm3 = vcmask 64512  }
  0xa6   : > { %v4285_v12 = vld [vmem:[#allocation2] sm:$0xff]  ;;  %543 = vmatpush.bf16.msra.mxu0 %v3853_v10  ;;  %s4155_s25 = smov 96   ;;  %s4156_s26 = smov 112   ;;  %vm631_vm4 = vcmask 1043456   ;;  %vm1031_vm5 = vcmask 130048   ;;  %vm1034_vm6 = vcmask 195584  }
  0xa7   : > { %v4063_v15 = vld [vmem:[%s4252_s30] ss:$0 sm:$0xff]  ;;  %s4157_s21 = smov 80   ;;  %s4158_s28 = smov 72  }
  0xa8   : > { %s4159_s29 = smov 104   ;;  %s4160_s12 = smov 64  }
  0xa9   : > { %s4161_s17 = smov 56   ;;  %s4162_s20 = smov 48  }
  0xaa   : > { %544 = vmatpush.bf16.msra.mxu0 %v3852_v11  ;;  %s4163_s19 = smov 40   ;;  %s4164_s13 = smov 8  }
  0xab   : > { %v4287_v13 = vld [vmem:[#allocation2 + $0x8] sm:$0xff]  ;;  %s4165_s14 = smov 16   ;;  %s4166_s16 = smov 24  }
  0xac   : > { %v515_v14 = vpack.c.bf16 %v4287_v13, %v4285_v12  ;;  %p3833_p5 = scmp.ne.s32.totalorder %s4235_s18, 1 }
  0xae   : > { %3151 = vmatmul.msk.bf16.vlgmr.msra.gmra.mxu0 %vm533_vm2, %v515_v14 }
 0x12b   : > { %v546_v16 = vpop.f32.mrf.mxu0 }
 0x12c   : > { %v547_v17 = vadd.f32 %v4063_v15, %v546_v16 }
 0x12e   : > { %v551_v18 = vpack.c.bf16 %v547_v17, %v547_v17 }
 0x130   : > { %v554_v19 = vunpack.c.l.b16 %v551_v18 }
 0x132   : > { %v4293_v20 = vpack.c.b16 %v554_v19, %v554_v19 }
 0x133   : > { %v548_v21 = vpop.f32.mrf.mxu0 }
 0x134   : > { %v549_v22 = vadd.f32 %v4063_v15, %v548_v21  ;;  %669 = vrot.lane.b32.xlu2 %v4293_v20, %s4153_s24  ;;  %671 = vrot.lane.b32.xlu1 %v4293_v20, %s4154_s23 }
 0x135   : > { %556 = vrot.lane.b32.xlu0 %v4293_v20, %s4155_s25 }
 0x136   : > { %v552_v23 = vpack.c.bf16 %v549_v22, %v549_v22 }
 0x138   : > { %v579_v24 = vunpack.c.l.b16 %v552_v23 }
 0x13a   : > { %v4298_v25 = vpack.c.b16 %v579_v24, %v579_v24 }
 0x13c   : > { %692 = vrot.lane.b32.xlu2 %v4298_v25, %s4153_s24  ;;  %694 = vrot.lane.b32.xlu1 %v4298_v25, %s4154_s23 }
 0x13d   : > { %581 = vrot.lane.b32.xlu0 %v4298_v25, %s4155_s25 }
 0x144   : > { %781 = vrot.lane.b32.xlu2 %v4293_v20, %s4156_s26  ;;  %806 = vrot.lane.b32.xlu1 %v4298_v25, %s4157_s21 }
 0x145   : > { %783 = vrot.lane.b32.xlu0 %v4293_v20, %s4157_s21 }
 0x14c   : > { %918 = vrot.lane.b32.xlu2 %v4298_v25, %s4158_s28  ;;  %895 = vrot.lane.b32.xlu1 %v4293_v20, %s4158_s28 }
 0x14d   : > { %804 = vrot.lane.b32.xlu0 %v4298_v25, %s4156_s26 }
 0x154   : > { %916 = vrot.lane.b32.xlu1 %v4298_v25, %s4159_s29 }
 0x155   : > { %893 = vrot.lane.b32.xlu0 %v4293_v20, %s4159_s29 }
 0x18e   : > { %v670_v26 = vpop.permute.xlu2 %669 }
 0x196   : > { %v693_v31 = vpop.permute.xlu2 %692 }
 0x19e   : > { %v782_v36 = vpop.permute.xlu2 %781 }
 0x1a6   : > { %v672_v27 = vpop.permute.xlu1 %671  ;;  %v919_v41 = vpop.permute.xlu2 %918 }
 0x1a7   : > { %v557_v28 = vpop.permute.xlu0 %556  ;;  %v677_v29 = vsel %vm558_vm3, %v672_v27, 0  ;;  %v924_v44 = vsel %vm558_vm3, %v919_v41, 0 }
 0x1a8   : > { %v563_v30 = vsel %vm558_vm3, %v557_v28, 0  ;;  %686 = vmatpush.bf16.xpose.msrb.mxu0 %v677_v29 }
 0x1a9   : > { %572 = vmatpush.bf16.xpose.msra.mxu1 %v563_v30 }
 0x1ae   : > { %v695_v32 = vpop.permute.xlu1 %694 }
 0x1af   : > { %v582_v33 = vpop.permute.xlu0 %581  ;;  %3156 = vmatmul.msk.bf16.vlgmr.msrb.gmra.mxu0 %vm558_vm3, %v670_v26  ;;  %v700_v34 = vsel %vm558_vm3, %v695_v32, 0 }
 0x1b0   : > { %3152 = vmatmul.msk.bf16.vlgmr.msra.gmra.mxu1 %vm558_vm3, %v551_v18  ;;  %v587_v35 = vsel %vm558_vm3, %v582_v33, 0 }
 0x1b1   : > { %596 = vmatpush.bf16.xpose.msra.mxu2 %v587_v35  ;;  %709 = vmatpush.bf16.xpose.msrb.mxu1 %v700_v34 }
 0x1b6   : > { %v807_v37 = vpop.permute.xlu1 %806 }
 0x1b7   : > { %v812_v38 = vsel %vm558_vm3, %v807_v37, 0  ;;  %v784_v39 = vpop.permute.xlu0 %783 }
 0x1b8   : > { %v789_v40 = vsel %vm558_vm3, %v784_v39, 0  ;;  %3153 = vmatmul.msk.bf16.vlgmr.msra.gmra.mxu2 %vm558_vm3, %v552_v23 }
 0x1b9   : > { %821 = vmatpush.bf16.xpose.msra.mxu1 %v812_v38  ;;  %798 = vmatpush.bf16.xpose.msra.mxu0 %v789_v40 }
 0x1be   : > { %v896_v42 = vpop.permute.xlu1 %895 }
 0x1bf   : > { %v901_v43 = vsel %vm558_vm3, %v896_v42, 0  ;;  %v805_v45 = vpop.permute.xlu0 %804 }
 0x1c0   : > { %3157 = vmatmul.msk.bf16.vlgmr.msrb.gmra.mxu1 %vm558_vm3, %v693_v31  ;;  %3160 = vmatmul.msk.bf16.vlgmr.msra.gmra.mxu0 %vm558_vm3, %v782_v36 }
 0x1c1   : > { %933 = vmatpush.bf16.xpose.msrb.mxu1 %v924_v44  ;;  %910 = vmatpush.bf16.xpose.msrb.mxu0 %v901_v43 }
 0x1c6   : > { %v917_v47 = vpop.permute.xlu1 %916 }
 0x1c7   : > { %v894_v46 = vpop.permute.xlu0 %893 }
 0x1d0   : > { %3161 = vmatmul.msk.bf16.vlgmr.msra.gmra.mxu1 %vm558_vm3, %v805_v45  ;;  %3164 = vmatmul.msk.bf16.vlgmr.msrb.gmra.mxu0 %vm558_vm3, %v894_v46 }
 0x1e0   : > { %3165 = vmatmul.msk.bf16.vlgmr.msrb.gmra.mxu1 %vm558_vm3, %v917_v47 }
 0x22c   : > { %v688_v48 = vpop.f32.mrf.mxu0 }
 0x22d   : > { %v574_v49 = vpop.f32.mrf.mxu1  ;;  %v715_v50 = vsel %vm558_vm3, %v688_v48, -inf }
 0x22e   : > { %716 = vmax.xlane.f32.xlu1 %v715_v50  ;;  %v602_v51 = vsel %vm558_vm3, %v574_v49, -inf }
 0x22f   : > { %603 = vmax.xlane.f32.xlu2 %v602_v51 }
 0x234   : > { %v690_v52 = vpop.f32.mrf.mxu0 }
 0x235   : > { %v576_v53 = vpop.f32.mrf.mxu1 }
 0x23b   : > { %v598_v54 = vpop.f32.mrf.mxu2 }
 0x23c   : > { %v605_v55 = vsel %vm558_vm3, %v598_v54, -inf }
 0x23d   : > { %v711_v56 = vpop.f32.mrf.mxu1  ;;  %606 = vmax.xlane.f32.xlu0 %v605_v55  ;;  %v4330_v57 = vpop.f32.mrf.mxu0 }
 0x23e   : > { %v718_v58 = vsel %vm558_vm3, %v711_v56, -inf  ;;  %v827_v6 = vsel %vm558_vm3, %v4330_v57, -inf }
 0x23f   : > { %719 = vmax.xlane.f32.xlu2 %v718_v58 }
 0x243   : > { %v600_v59 = vpop.f32.mrf.mxu2 }
 0x245   : > { %v713_v60 = vpop.f32.mrf.mxu1  ;;  %v802_v61 = vpop.f32.mrf.mxu0 }
 0x247   : > { %648 = vrot.lane.b32.xlu1 %v4298_v25, %s4160_s12 }
 0x24d   : > { %v4334_v62 = vpop.f32.mrf.mxu1  ;;  %v4336_v63 = vpop.f32.mrf.mxu0 }
 0x24e   : > { %v830_v5 = vsel %vm558_vm3, %v4334_v62, -inf  ;;  %v939_v7 = vsel %vm558_vm3, %v4336_v63, -inf }
 0x24f   : > { %760 = vrot.lane.b32.xlu1 %v4298_v25, %s4161_s17 }
 0x251   : > { %739 = vrot.lane.b32.xlu0 %v4293_v20, %s4161_s17 }
 0x255   : > { %v825_v0 = vpop.f32.mrf.mxu1  ;;  %v914_v1 = vpop.f32.mrf.mxu0 }
 0x257   : > { %626 = vrot.lane.b32.xlu2 %v4293_v20, %s4160_s12 }
 0x25d   : > { %v935_v2 = vpop.f32.mrf.mxu1 }
 0x25e   : > { %v942_v4 = vsel %vm558_vm3, %v935_v2, -inf }
 0x265   : > { %v937_v3 = vpop.f32.mrf.mxu1 }
 0x279   : > { %943 = vmax.xlane.f32.xlu1 %v942_v4 }
 0x27b   : > { %831 = vmax.xlane.f32.xlu0 %v830_v5 }
 0x280   : > { %828 = vmax.xlane.f32.xlu2 %v827_v6 }
 0x283   : > { %940 = vmax.xlane.f32.xlu0 %v939_v7 }
 0x2a1   : > { %v717_v8 = vpop.xlane.xlu1 %716 }
 0x2a2   : > { %v721_v9 = vsub.f32 %v688_v48, %v717_v8  ;;  %v604_v10 = vpop.xlane.xlu2 %603 }
 0x2a3   : > { %v608_v11 = vsub.f32 %v574_v49, %v604_v10 }
 0x2a4   : > { %v723_v14 = vmul.f32 1.442695, %v721_v9 }
 0x2a5   : > { %v610_v15 = vmul.f32 1.442695, %v608_v11 }
 0x2a6   : > { %4070 = vpow2.f32 %v723_v14 }
 0x2a7   : > { %4072 = vpow2.f32 %v610_v15 }
 0x2ac   : > { %v4348_v16 = vpop.eup %4070 }
 0x2ad   : > { %v4350_v17 = vpop.eup %4072  ;;  %v727_v18 = vsel %vm558_vm3, %v4348_v16, 0.0 }
 0x2ae   : > { %v614_v19 = vsel %vm558_vm3, %v4350_v17, 0.0  ;;  %728 = vadd.xlane.f32.xlu0 %v727_v18 }
 0x2af   : > { %615 = vadd.xlane.f32.xlu1 %v614_v19 }
 0x2b0   : > { %v607_v21 = vpop.xlane.xlu0 %606 }
 0x2b1   : > { %v609_v22 = vsub.f32 %v598_v54, %v607_v21 }
 0x2b2   : > { %v720_v23 = vpop.xlane.xlu2 %719 }
 0x2b3   : > { %v612_v24 = vmul.f32 1.442695, %v609_v22  ;;  %v722_v26 = vsub.f32 %v711_v56, %v720_v23 }
 0x2b5   : > { %4074 = vpow2.f32 %v612_v24  ;;  %v725_v27 = vmul.f32 1.442695, %v722_v26 }
 0x2b7   : > { %4076 = vpow2.f32 %v725_v27 }
 0x2b9   : > { %v649_v28 = vpop.permute.xlu1 %648 }
 0x2ba   : > { %v627_v29 = vpop.permute.xlu2 %626  ;;  %v654_v30 = vsel %vm631_vm4, %v649_v28, 0 }
 0x2bb   : > { %v4357_v31 = vpop.eup %4074  ;;  %v633_v32 = vsel %vm631_vm4, %v627_v29, 0 }
 0x2bc   : > { %642 = vmatpush.bf16.msra.mxu3 %v633_v32  ;;  %v617_v33 = vsel %vm558_vm3, %v4357_v31, 0.0 }
 0x2bd   : > { %v4362_v34 = vpop.eup %4076  ;;  %618 = vadd.xlane.f32.xlu0 %v617_v33 }
 0x2be   : > { %v730_v35 = vsel %vm558_vm3, %v4362_v34, 0.0 }
 0x2bf   : > { %731 = vadd.xlane.f32.xlu2 %v730_v35 }
 0x2c0   : > { %663 = vmatpush.bf16.msrb.mxu3 %v654_v30 }
 0x2c1   : > { %v761_v38 = vpop.permute.xlu1 %760 }
 0x2c2   : > { %v766_v3 = vsel %vm631_vm4, %v761_v38, 0 }
 0x2c3   : > { %v740_v36 = vpop.permute.xlu0 %739 }
 0x2c4   : > { %v745_v37 = vsel %vm631_vm4, %v740_v36, 0 }
 0x2c5   : > { %754 = vmatpush.bf16.msrb.mxu2 %v745_v37 }
 0x2c8   : > { %872 = vrot.lane.b32.xlu1 %v4298_v25, %s4162_s20 }
 0x2d7   : > { %851 = vrot.lane.b32.xlu2 %v4293_v20, %s4162_s20 }
 0x2ec   : > { %v944_v39 = vpop.xlane.xlu1 %943 }
 0x2ed   : > { %v946_v40 = vsub.f32 %v935_v2, %v944_v39 }
 0x2ee   : > { %v832_v41 = vpop.xlane.xlu0 %831 }
 0x2ef   : > { %v834_v42 = vsub.f32 %v4334_v62, %v832_v41  ;;  %v949_v44 = vmul.f32 1.442695, %v946_v40 }
 0x2f1   : > { %v837_v43 = vmul.f32 1.442695, %v834_v42 }
 0x2f3   : > { %4078 = vpow2.f32 %v837_v43  ;;  %v829_v45 = vpop.xlane.xlu2 %828 }
 0x2f4   : > { %v833_v46 = vsub.f32 %v4330_v57, %v829_v45  ;;  %4080 = vpow2.f32 %v949_v44 }
 0x2f6   : > { %v835_v47 = vmul.f32 1.442695, %v833_v46  ;;  %v941_v48 = vpop.xlane.xlu0 %940 }
 0x2f7   : > { %v945_v49 = vsub.f32 %v4336_v63, %v941_v48 }
 0x2f8   : > { %4082 = vpow2.f32 %v835_v47 }
 0x2f9   : > { %v4079_v50 = vpop.eup %4078  ;;  %v947_v51 = vmul.f32 1.442695, %v945_v49 }
 0x2fa   : > { %v842_v52 = vsel %vm558_vm3, %v4079_v50, 0.0  ;;  %v4373_v53 = vpop.eup %4080 }
 0x2fb   : > { %4084 = vpow2.f32 %v947_v51  ;;  %843 = vadd.xlane.f32.xlu0 %v842_v52  ;;  %v954_v56 = vsel %vm558_vm3, %v4373_v53, 0.0 }
 0x2fe   : > { %v4083_v54 = vpop.eup %4082 }
 0x2ff   : > { %v839_v55 = vsel %vm558_vm3, %v4083_v54, 0.0 }
 0x300   : > { %840 = vadd.xlane.f32.xlu1 %v839_v55  ;;  %955 = vadd.xlane.f32.xlu2 %v954_v56 }
 0x301   : > { %v4085_v57 = vpop.eup %4084 }
 0x302   : > { %v951_v58 = vsel %vm558_vm3, %v4085_v57, 0.0 }
 0x303   : > { %952 = vadd.xlane.f32.xlu0 %v951_v58  ;;  %v3854_v58 = vld [vmem:[%s4247_s27] sm:$0xff] }
 0x317   : > { %963 = vrot.lane.b32.xlu0 %v4293_v20, %s4163_s19 }
 0x319   : > { %984 = vrot.lane.b32.xlu1 %v4298_v25, %s4163_s19 }
 0x321   : > { %v729_v59 = vpop.xlane.xlu0 %728 }
 0x322   : > { %v616_v60 = vpop.xlane.xlu1 %615  ;;  %4086 = vrcp.f32 %v729_v59 }
 0x323   : > { %4088 = vrcp.f32 %v616_v60 }
 0x328   : > { %v4087_v61 = vpop.eup %4086 }
 0x329   : > { %v4089_v62 = vpop.eup %4088  ;;  %v735_v63 = vmul.f32 %v4087_v61, %v4348_v16 }
 0x32a   : > { %v622_v0 = vmul.f32 %v4089_v62, %v4350_v17 }
 0x32b   : > { %v737_v1 = vpack.c.bf16 %v735_v63, %v735_v63 }
 0x32c   : > { %v624_v2 = vpack.c.bf16 %v622_v0, %v622_v0 }
 0x32d   : > { %3158 = vmatmul.msk.bf16.vlgmr.msrb.gmra.mxu2 %vm558_vm3, %v737_v1 }
 0x32e   : > { %3154 = vmatmul.msk.bf16.vlgmr.msra.gmra.mxu3 %vm558_vm3, %v624_v2 }
 0x32f   : > { %775 = vmatpush.bf16.msra.mxu3 %v766_v3 }
 0x330   : > { %v619_v20 = vpop.xlane.xlu0 %618 }
 0x331   : > { %4090 = vrcp.f32 %v619_v20 }
 0x332   : > { %v732_v25 = vpop.xlane.xlu2 %731 }
 0x333   : > { %4092 = vrcp.f32 %v732_v25 }
 0x337   : > { %v4091_v4 = vpop.eup %4090 }
 0x338   : > { %v623_v5 = vmul.f32 %v4091_v4, %v4357_v31 }
 0x339   : > { %v4093_v11 = vpop.eup %4092 }
 0x33a   : > { %v852_v6 = vpop.permute.xlu2 %851  ;;  %v873_v8 = vpop.permute.xlu1 %872  ;;  %v625_v9 = vpack.c.bf16 %v623_v5, %v623_v5  ;;  %v736_v14 = vmul.f32 %v4093_v11, %v4362_v34 }
 0x33b   : > { %v857_v7 = vsel %vm631_vm4, %v852_v6, 0  ;;  %v878_v10 = vsel %vm631_vm4, %v873_v8, 0 }
 0x33c   : > { %866 = vmatpush.bf16.msra.mxu2 %v857_v7  ;;  %v738_v15 = vpack.c.bf16 %v736_v14, %v736_v14 }
 0x33e   : > { %3155 = vmatmul.msk.bf16.vlgmr.msrb.gmra.mxu3 %vm558_vm3, %v625_v9  ;;  %v4064_v9 = vld [vmem:[%s4252_s30 + $0x1] ss:$0 sm:$0xff] }
 0x33f   : > { %887 = vmatpush.bf16.msrb.mxu3 %v878_v10 }
 0x34e   : > { %3159 = vmatmul.msk.bf16.vlgmr.msra.gmra.mxu3 %vm558_vm3, %v738_v15 }
 0x36e   : > { %v844_v16 = vpop.xlane.xlu0 %843 }
 0x36f   : > { %4094 = vrcp.f32 %v844_v16 }
 0x373   : > { %v841_v17 = vpop.xlane.xlu1 %840  ;;  %v956_v24 = vpop.xlane.xlu2 %955 }
 0x374   : > { %4096 = vrcp.f32 %v841_v17 }
 0x375   : > { %v4095_v18 = vpop.eup %4094  ;;  %4098 = vrcp.f32 %v956_v24 }
 0x376   : > { %v848_v19 = vmul.f32 %v4095_v18, %v4079_v50  ;;  %v953_v27 = vpop.xlane.xlu0 %952 }
 0x377   : > { %4100 = vrcp.f32 %v953_v27 }
 0x378   : > { %v850_v21 = vpack.c.bf16 %v848_v19, %v848_v19 }
 0x37a   : > { %3163 = vmatmul.msk.bf16.vlgmr.msrb.gmra.mxu3 %vm558_vm3, %v850_v21  ;;  %v4097_v22 = vpop.eup %4096  ;;  %v4167_v21 = vmov 32.0  }
 0x37b   : > { %v847_v23 = vmul.f32 %v4097_v22, %v4083_v54  ;;  %v4099_v28 = vpop.eup %4098  ;;  %4102 = vrcp.f32 %v4167_v21 }
 0x37c   : > { %v960_v31 = vmul.f32 %v4099_v28, %v4373_v53 }
 0x37d   : > { %v849_v26 = vpack.c.bf16 %v847_v23, %v847_v23  ;;  %v4101_v29 = vpop.eup %4100 }
 0x37e   : > { %v959_v32 = vmul.f32 %v4101_v29, %v4085_v57  ;;  %v962_v36 = vpack.c.bf16 %v960_v31, %v960_v31  ;;  %v3855_v57 = vld [vmem:[%s4247_s27 + $0x8] sm:$0xff] }
 0x37f   : > { %3162 = vmatmul.msk.bf16.vlgmr.msra.gmra.mxu2 %vm558_vm3, %v849_v26  ;;  %1064 = vmatpush.bf16.msra.mxu0 %v3855_v57  ;;  %v3187_v57 = vld [vmem:[%s4257_s15 + $0x8] sm:$0xf] }
 0x380   : > { %v961_v37 = vpack.c.bf16 %v959_v32, %v959_v32 }
 0x381   : > { %v4103_v22 = vpop.eup %4102 }
 0x382   : > { %v1081_v23 = vmul.f32 32.0, %v4103_v22  ;;  %vm1085_vm7 = vweird.f32 %v4103_v22 }
 0x383   : > { %1065 = vmatpush.bf16.msra.mxu0 %v3854_v58 }
 0x384   : > { %v1082_v24 = vsub.f32 1.0, %v1081_v23  ;;  %v3223_v23 = vld [vmem:[%s4257_s15 + $0x18] sm:$0xf] }
 0x386   : > { %v1083_v26 = vmul.f32 %v4103_v22, %v1082_v24  ;;  %v3899_v24 = vld [vmem:[%s4257_s15 + $0x54] sm:$0xf0] }
 0x388   : > { %v1084_v27 = vadd.f32 %v4103_v22, %v1083_v26 }
 0x389   : > { %v964_v30 = vpop.permute.xlu0 %963 }
 0x38a   : > { %v969_v33 = vsel %vm631_vm4, %v964_v30, 0 }
 0x38b   : > { %v985_v34 = vpop.permute.xlu1 %984  ;;  %978 = vmatpush.bf16.msrb.mxu2 %v969_v33 }
 0x38c   : > { %v990_v35 = vsel %vm631_vm4, %v985_v34, 0 }
 0x38d   : > { %999 = vmatpush.bf16.msra.mxu3 %v990_v35 }
 0x38f   : > { %3166 = vmatmul.msk.bf16.vlgmr.msrb.gmra.mxu2 %vm558_vm3, %v961_v37  ;;  %v3195_v37 = vld [vmem:[%s4257_s15 + $0x80] sm:$0xf] }
 0x390   : > { %3167 = vmatmul.msk.bf16.vlgmr.msra.gmra.mxu3 %vm558_vm3, %v962_v36 }
 0x3b0   : > { %v756_v38 = vpop.f32.mrf.mxu2 }
 0x3b1   : > { %v644_v39 = vpop.f32.mrf.mxu3 }
 0x3b8   : > { %v758_v40 = vpop.f32.mrf.mxu2 }
 0x3b9   : > { %v646_v41 = vpop.f32.mrf.mxu3 }
 0x3ba   : > { %v3197_v41 = vld [vmem:[%s4257_s15 + $0xc0] sm:$0xf0] }
 0x3c1   : > { %v665_v42 = vpop.f32.mrf.mxu3 }
 0x3c9   : > { %v667_v43 = vpop.f32.mrf.mxu3 }
 0x3ca   : > { %v3863_v43 = vld [vmem:[%s4257_s15 + $0xc4] sm:$0xf0] }
 0x3d1   : > { %v777_v44 = vpop.f32.mrf.mxu3 }
 0x3d2   : > { %v4048_v45 = vpack.i.bf16 %v777_v44, %v756_v38  ;;  %v3862_v38 = vld [vmem:[%s4257_s15 + $0xbc] sm:$0xf0] }
 0x3d3   : > { %v3196_v40 = vor.u32 %v3862_v38, %v3195_v37 }
 0x3d4   : > { %4049 = vrot.lane.b32.xlu0 %v4048_v45, %s4164_s13 }
 0x3d5   : > { %1199 = vmatpush.bf16.msra.mxu1 %v3196_v40 }
 0x3d9   : > { %v779_v46 = vpop.f32.mrf.mxu3 }
 0x3fd   : > { %v889_v47 = vpop.f32.mrf.mxu3 }
 0x402   : > { %v868_v48 = vpop.f32.mrf.mxu2 }
 0x403   : > { %v4053_v49 = vpack.i.bf16 %v889_v47, %v868_v48  ;;  %v3861_v47 = vld [vmem:[%s4257_s15 + $0x8c] sm:$0xf] }
 0x404   : > { %v3205_v48 = vld [vmem:[%s4257_s15 + $0xc8] sm:$0xf0] }
 0x405   : > { %v891_v50 = vpop.f32.mrf.mxu3  ;;  %4054 = vrot.lane.b32.xlu1 %v4053_v49, %s4165_s14 }
 0x406   : > { %v3208_v50 = vor.u32 %v3861_v47, %v3205_v48 }
 0x408   : > { %1241 = vmatpush.bf16.msrb.mxu0 %v3208_v50 }
 0x40a   : > { %v870_v51 = vpop.f32.mrf.mxu2 }
 0x40b   : > { %v3179_v51 = vld [vmem:[%s4257_s15] sm:$0xf] }
 0x412   : > { %v980_v52 = vpop.f32.mrf.mxu2 }
 0x413   : > { %v1001_v53 = vpop.f32.mrf.mxu3 }
 0x414   : > { %v4058_v54 = vpack.i.bf16 %v1001_v53, %v980_v52  ;;  %v3858_v52 = vld [vmem:[%s4257_s15 + $0x3c] sm:$0xf0]  ;;  %v3856_v53 = vld [vmem:[%s4257_s15 + $0x4] sm:$0xf] }
 0x416   : > { %4059 = vrot.lane.b32.xlu0 %v4058_v54, %s4166_s16 }
 0x41a   : > { %v982_v55 = vpop.f32.mrf.mxu2 }
 0x41b   : > { %v1003_v56 = vpop.f32.mrf.mxu3  ;;  %v3180_v55 = vor.u32 %v3858_v52, %v3179_v51 }
 0x41c   : > { %v3181_v56 = vld [vmem:[%s4257_s15 + $0x40] sm:$0xf0] }
 0x41d   : > { %v3184_v58 = vor.u32 %v3856_v53, %v3181_v56  ;;  %1200 = vmatpush.bf16.msra.mxu1 %v3180_v55  ;;  %v3935_v53 = vld [vmem:[%s4267_s3 + $0x1f8] sm:$0xff]  ;;  %v3934_v56 = vld [vmem:[%s4267_s3 + $0x1f0] sm:$0xff] }
 0x41e   : > { %v3927_v55 = vld [vmem:[%s4267_s3 + $0x1b8] sm:$0xff] }
 0x446   : > { %v4050_v59 = vpop.permute.xlu0 %4049 }
 0x447   : > { %v4052_v61 = vunpack.i.h.bf16 %v4050_v59  ;;  %v4051_v62 = vunpack.i.l.bf16 %v4050_v59  ;;  %v3859_v59 = vld [vmem:[%s4257_s15 + $0x44] sm:$0xf0] }
 0x449   : > { %v1030_v2 = vsel %vm558_vm3, %v665_v42, %v4052_v61  ;;  %v1029_v3 = vsel %vm558_vm3, %v644_v39, %v4051_v62  ;;  %v3860_v39 = vld [vmem:[%s4257_s15 + $0x84] sm:$0xf]  ;;  %v3203_v42 = vld [vmem:[%s4257_s15 + $0x88] sm:$0xf]  ;;  %v3189_v61 = vld [vmem:[%s4257_s15 + $0x48] sm:$0xf0]  ;;  %v3188_v62 = vor.u32 %v3859_v59, %v3187_v57 }
 0x44a   : > { %v3200_v45 = vor.u32 %v3860_v39, %v3197_v41  ;;  %v3204_v46 = vor.u32 %v3863_v43, %v3203_v42  ;;  %v4065_v42 = vld [vmem:[%s4252_s30 + $0x2] ss:$0 sm:$0xff]  ;;  %v3918_v57 = vld [vmem:[%s4267_s3 + $0x170] sm:$0xff]  ;;  %v3909_v59 = vld [vmem:[%s4267_s3 + $0x128] sm:$0xff] }
 0x44c   : > { %1213 = vmatpush.bf16.msra.mxu2 %v3200_v45  ;;  %1227 = vmatpush.bf16.msrb.mxu3 %v3204_v46  ;;  %v4066_v46 = vld [vmem:[%s4252_s30 + $0x3] ss:$0 sm:$0xff] }
 0x450   : > { %1214 = vmatpush.bf16.msra.mxu2 %v3184_v58  ;;  %1228 = vmatpush.bf16.msrb.mxu3 %v3188_v62  ;;  %v3926_v58 = vld [vmem:[%s4267_s3 + $0x1b0] sm:$0xff]  ;;  %v3932_v62 = vld [vmem:[%s4267_s3 + $0x1e0] sm:$0xff] }
 0x477   : > { %v4055_v60 = vpop.permute.xlu1 %4054 }
 0x478   : > { %v4057_v63 = vunpack.i.h.bf16 %v4055_v60  ;;  %v4056_v0 = vunpack.i.l.bf16 %v4055_v60  ;;  %v3857_v60 = vld [vmem:[%s4257_s15 + $0xc] sm:$0xf] }
 0x47a   : > { %v1032_v4 = vsel %vm1031_vm5, %v1029_v3, %v4056_v0  ;;  %v1033_v5 = vsel %vm1031_vm5, %v1030_v2, %v4057_v63  ;;  %v3192_v63 = vor.u32 %v3857_v60, %v3189_v61  ;;  %v3902_v2 = vld [vmem:[%s4257_s15 + $0xcc] sm:$0xf0]  ;;  %v3900_v3 = vld [vmem:[%s4257_s15 + $0x94] sm:$0xf]  ;;  %v3933_v60 = vld [vmem:[%s4267_s3 + $0x1e8] sm:$0xff] }
 0x47b   : > { %v3908_v61 = vld [vmem:[%s4267_s3 + $0x120] sm:$0xff] }
 0x47c   : > { %1242 = vmatpush.bf16.msrb.mxu0 %v3192_v63  ;;  %v3917_v63 = vld [vmem:[%s4267_s3 + $0x168] sm:$0xff] }
 0x488   : > { %v4060_v1 = vpop.permute.xlu0 %4059 }
 0x489   : > { %v4062_v20 = vunpack.i.h.bf16 %v4060_v1  ;;  %v4061_v25 = vunpack.i.l.bf16 %v4060_v1  ;;  %v3231_v1 = vld [vmem:[%s4257_s15 + $0x90] sm:$0xf] }
 0x48b   : > { %v1035_v6 = vsel %vm1034_vm6, %v1032_v4, %v4061_v25  ;;  %v1036_v7 = vsel %vm1034_vm6, %v1033_v5, %v4062_v20  ;;  %v3232_v25 = vor.u32 %v3902_v2, %v3231_v1  ;;  %v3233_v4 = vld [vmem:[%s4257_s15 + $0xd0] sm:$0xf0]  ;;  %v3239_v5 = vld [vmem:[%s4257_s15 + $0x98] sm:$0xf] }
 0x48c   : > { %v1037_v8 = vpack.c.bf16 %v1036_v7, %v1035_v6  ;;  %v3903_v6 = vld [vmem:[%s4257_s15 + $0xd4] sm:$0xf0]  ;;  %v3236_v7 = vor.u32 %v3900_v3, %v3233_v4  ;;  %v3916_v3 = vld [vmem:[%s4267_s3 + $0x160] sm:$0xff]  ;;  %v3930_v4 = vld [vmem:[%s4267_s3 + $0x1d0] sm:$0xff] }
 0x48d   : > { %1389 = vmatpush.bf16.msrb.mxu1 %v3232_v25  ;;  %v3907_v1 = vld [vmem:[%s4267_s3 + $0x118] sm:$0xff]  ;;  %v3906_v25 = vld [vmem:[%s4267_s3 + $0x110] sm:$0xff] }
 0x48e   : > { %3176 = vmatmul.msk.bf16.vlgmr.msra.gmra.mxu0 %vm533_vm2, %v1037_v8  ;;  %v3240_v8 = vor.u32 %v3903_v6, %v3239_v5  ;;  %1403 = vmatpush.bf16.msrb.mxu2 %v3236_v7  ;;  %v3931_v2 = vld [vmem:[%s4267_s3 + $0x1d8] sm:$0xff]  ;;  %v3905_v7 = vld [vmem:[%s4267_s3 + $0x108] sm:$0xff] }
 0x48f   : > { %v3915_v5 = vld [vmem:[%s4267_s3 + $0x158] sm:$0xff] }
 0x490   : > { %1417 = vmatpush.bf16.msra.mxu3 %v3240_v8  ;;  %v3923_v6 = vld [vmem:[%s4267_s3 + $0x198] sm:$0xff]  ;;  %v3929_v8 = vld [vmem:[%s4267_s3 + $0x1c8] sm:$0xff] }
 0x50b   : > { %v1067_v10 = vpop.f32.mrf.mxu0 }
 0x50c   : > { %v1068_v11 = vadd.f32 %v4064_v9, %v1067_v10  ;;  %v3241_v10 = vld [vmem:[%s4257_s15 + $0xd8] sm:$0xf0] }
 0x50e   : > { %v1072_v14 = vadd.f32 %v1068_v11, %v4285_v12  ;;  %v4409_v12 = vsel %vm1085_vm7, %v4103_v22, %v1084_v27  ;;  %v3215_v11 = vld [vmem:[%s4257_s15 + $0x10] sm:$0xf]  ;;  %v3217_v22 = vld [vmem:[%s4257_s15 + $0x50] sm:$0xf0]  ;;  %v3224_v27 = vor.u32 %v3899_v24, %v3223_v23  ;;  %v3920_v23 = vld [vmem:[%s4267_s3 + $0x180] sm:$0xff] }
 0x50f   : > { %v3879_v24 = vld [vmem:[%s4267_s3 + $0x78] sm:$0xff] }
 0x510   : > { %v1074_v15 = vsel %vm533_vm2, %v1072_v14, 0.0  ;;  %1418 = vmatpush.bf16.msra.mxu3 %v3224_v27  ;;  %v3869_v27 = vld [vmem:[%s4267_s3 + $0x28] sm:$0xff] }
 0x511   : > { %1075 = vadd.xlane.f32.xlu1 %v1074_v15 }
 0x513   : > { %v1069_v16 = vpop.f32.mrf.mxu0 }
 0x514   : > { %v1070_v17 = vadd.f32 %v4064_v9, %v1069_v16  ;;  %v3901_v9 = vld [vmem:[%s4257_s15 + $0x9c] sm:$0xf] }
 0x515   : > { %v3244_v16 = vor.u32 %v3901_v9, %v3241_v10  ;;  %v3914_v9 = vld [vmem:[%s4267_s3 + $0x150] sm:$0xff] }
 0x516   : > { %v1073_v18 = vadd.f32 %v1070_v17, %v4287_v13  ;;  %v3898_v17 = vld [vmem:[%s4257_s15 + $0x4c] sm:$0xf0] }
 0x517   : > { %v3216_v21 = vor.u32 %v3898_v17, %v3215_v11  ;;  %1431 = vmatpush.bf16.msra.mxu0 %v3244_v16  ;;  %v3922_v10 = vld [vmem:[%s4267_s3 + $0x190] sm:$0xff]  ;;  %v3904_v11 = vld [vmem:[%s4267_s3 + $0x100] sm:$0xff]  ;;  %v3895_v16 = vld [vmem:[%s4267_s3 + $0xf8] sm:$0xff] }
 0x518   : > { %v1077_v19 = vsel %vm533_vm2, %v1073_v18, 0.0  ;;  %v3913_v17 = vld [vmem:[%s4267_s3 + $0x148] sm:$0xff] }
 0x519   : > { %1078 = vadd.xlane.f32.xlu2 %v1077_v19  ;;  %1390 = vmatpush.bf16.msrb.mxu1 %v3216_v21  ;;  %v3894_v21 = vld [vmem:[%s4267_s3 + $0xf0] sm:$0xff] }
 0x584   : > { %v1076_v28 = vpop.xlane.xlu1 %1075 }
 0x585   : > { %v1087_v13 = vmul.f32 %v4409_v12, %v1076_v28  ;;  %v3897_v28 = vld [vmem:[%s4257_s15 + $0x1c] sm:$0xf] }
 0x587   : > { %v4412_v29 = vsub.f32 %v1072_v14, %v1087_v13  ;;  %v3225_v13 = vld [vmem:[%s4257_s15 + $0x58] sm:$0xf0] }
 0x589   : > { %v1091_v30 = vmul.f32 %v4412_v29, %v4412_v29 }
 0x58b   : > { %v1093_v31 = vsel %vm533_vm2, %v1091_v30, 0.0 }
 0x58c   : > { %v1079_v32 = vpop.xlane.xlu2 %1078  ;;  %1094 = vadd.xlane.f32.xlu0 %v1093_v31  ;;  %v3228_v31 = vor.u32 %v3897_v28, %v3225_v13  ;;  %v3893_v28 = vld [vmem:[%s4267_s3 + $0xe8] sm:$0xff]  ;;  %v3878_v13 = vld [vmem:[%s4267_s3 + $0x70] sm:$0xff] }
 0x58d   : > { %v1088_v33 = vmul.f32 %v4409_v12, %v1079_v32 }
 0x58e   : > { %1432 = vmatpush.bf16.msra.mxu0 %v3228_v31  ;;  %v3868_v31 = vld [vmem:[%s4267_s3 + $0x20] sm:$0xff] }
 0x58f   : > { %v4418_v34 = vsub.f32 %v1073_v18, %v1088_v33  ;;  %v3896_v18 = vld [vmem:[%s4257_s15 + $0x14] sm:$0xf] }
 0x590   : > { %v3220_v26 = vor.u32 %v3896_v18, %v3217_v22  ;;  %v3921_v18 = vld [vmem:[%s4267_s3 + $0x188] sm:$0xff]  ;;  %v3912_v22 = vld [vmem:[%s4267_s3 + $0x140] sm:$0xff] }
 0x591   : > { %v1092_v35 = vmul.f32 %v4418_v34, %v4418_v34 }
 0x592   : > { %1404 = vmatpush.bf16.msrb.mxu2 %v3220_v26  ;;  %v3887_v26 = vld [vmem:[%s4267_s3 + $0xb8] sm:$0xff] }
 0x593   : > { %v1096_v36 = vsel %vm533_vm2, %v1092_v35, 0.0 }
 0x594   : > { %1097 = vadd.xlane.f32.xlu2 %v1096_v36 }
 0x5ff   : > { %v1095_v44 = vpop.xlane.xlu0 %1094 }
 0x600   : > { %v1099_v49 = vmul.f32 %v1095_v44, %v4409_v12 }
 0x602   : > { %v4435_v54 = vadd.f32 1e-05, %v1099_v49 }
 0x604   : > { %4104 = vrsqrt.f32 %v4435_v54  ;;  %vm1109_vm9 = vweird.f32 %v4435_v54 }
 0x607   : > { %v1098_v0 = vpop.xlane.xlu2 %1097 }
 0x608   : > { %v1100_v20 = vmul.f32 %v1098_v0, %v4409_v12  ;;  %v3925_v0 = vld [vmem:[%s4267_s3 + $0x1a8] sm:$0xff] }
 0x60a   : > { %v4105_v14 = vpop.eup %4104  ;;  %v1102_v15 = vadd.f32 1e-05, %v1100_v20  ;;  %v3924_v20 = vld [vmem:[%s4267_s3 + $0x1a0] sm:$0xff] }
 0x60b   : > { %v1104_v19 = vmul.f32 %v4105_v14, %v4435_v54  ;;  %vm1110_vm8 = vweird.f32 %v4105_v14  ;;  %v3919_v54 = vld [vmem:[%s4267_s3 + $0x178] sm:$0xff] }
 0x60c   : > { %4106 = vrsqrt.f32 %v1102_v15  ;;  %vm1111_vm10 = vmor %vm1109_vm9, %vm1110_vm8  ;;  %vm1119_vm12 = vweird.f32 %v1102_v15 }
 0x60d   : > { %v1105_v30 = vmul.f32 %v4105_v14, %v1104_v19  ;;  %v3870_v19 = vld [vmem:[%s4267_s3 + $0x30] sm:$0xff] }
 0x60f   : > { %v1106_v32 = vmul.f32 0.5, %v1105_v30  ;;  %v3886_v30 = vld [vmem:[%s4267_s3 + $0xb0] sm:$0xff] }
 0x611   : > { %v1107_v33 = vsub.f32 1.5, %v1106_v32  ;;  %v3892_v32 = vld [vmem:[%s4267_s3 + $0xe0] sm:$0xff] }
 0x612   : > { %v4107_v35 = vpop.eup %4106 }
 0x613   : > { %v1108_v36 = vmul.f32 %v4105_v14, %v1107_v33  ;;  %v1114_v37 = vmul.f32 %v4107_v35, %v1102_v15  ;;  %vm1120_vm11 = vweird.f32 %v4107_v35  ;;  %v3871_v15 = vld [vmem:[%s4267_s3 + $0x38] sm:$0xff]  ;;  %v3877_v33 = vld [vmem:[%s4267_s3 + $0x68] sm:$0xff] }
 0x614   : > { %vm1121_vm13 = vmor %vm1119_vm12, %vm1120_vm11 }
 0x615   : > { %v1115_v38 = vmul.f32 %v4107_v35, %v1114_v37  ;;  %v1112_v39 = vsel %vm1111_vm10, %v4105_v14, %v1108_v36  ;;  %v3928_v14 = vld [vmem:[%s4267_s3 + $0x1c0] sm:$0xff]  ;;  %v3867_v36 = vld [vmem:[%s4267_s3 + $0x18] sm:$0xff] }
 0x616   : > { %v1123_v43 = vmul.f32 %v1112_v39, %v4412_v29  ;;  %v3911_v29 = vld [vmem:[%s4267_s3 + $0x138] sm:$0xff] }
 0x617   : > { %v1116_v40 = vmul.f32 0.5, %v1115_v38  ;;  %v3891_v37 = vld [vmem:[%s4267_s3 + $0xd8] sm:$0xff] }
 0x618   : > { %v1126_v47 = vmul.f32 %v4065_v42, %v1123_v43  ;;  %v3890_v43 = vld [vmem:[%s4267_s3 + $0xd0] sm:$0xff] }
 0x619   : > { %v1117_v41 = vsub.f32 1.5, %v1116_v40  ;;  %v3876_v40 = vld [vmem:[%s4267_s3 + $0x60] sm:$0xff] }
 0x61a   : > { %v4466_v50 = vadd.f32 %v4066_v46, %v1126_v47  ;;  %v3865_v47 = vld [vmem:[%s4267_s3 + $0x8] sm:$0xff] }
 0x61b   : > { %v1118_v44 = vmul.f32 %v4107_v35, %v1117_v41  ;;  %v3884_v41 = vld [vmem:[%s4267_s3 + $0xa0] sm:$0xff] }
 0x61d   : > { %v1122_v45 = vsel %vm1121_vm13, %v4107_v35, %v1118_v44  ;;  %v3885_v35 = vld [vmem:[%s4267_s3 + $0xa8] sm:$0xff]  ;;  %v3875_v44 = vld [vmem:[%s4267_s3 + $0x58] sm:$0xff] }
 0x61e   : > { %v1124_v48 = vmul.f32 %v1122_v45, %v4418_v34  ;;  %v3910_v34 = vld [vmem:[%s4267_s3 + $0x130] sm:$0xff]  ;;  %v3883_v45 = vld [vmem:[%s4267_s3 + $0x98] sm:$0xff] }
 0x620   : > { %v1127_v49 = vmul.f32 %v4065_v42, %v1124_v48  ;;  %v3866_v42 = vld [vmem:[%s4267_s3 + $0x10] sm:$0xff]  ;;  %v3889_v48 = vld [vmem:[%s4267_s3 + $0xc8] sm:$0xff] }
 0x622   : > { %v4468_v51 = vadd.f32 %v4066_v46, %v1127_v49 }
 0x624   : > { %v4472_v52 = vpack.c.bf16 %v4468_v51, %v4466_v50 }
 0x626   : > { %3209 = vmatmul.msk.bf16.vlgmr.msra.gmra.mxu1 %vm533_vm2, %v4472_v52  ;;  %3210 = vmatmul.msk.bf16.vlgmr.msra.gmra.mxu2 %vm533_vm2, %v4472_v52 }
 0x627   : > { %3211 = vmatmul.msk.bf16.vlgmr.msrb.gmra.mxu3 %vm533_vm2, %v4472_v52  ;;  %3212 = vmatmul.msk.bf16.vlgmr.msrb.gmra.mxu0 %vm533_vm2, %v4472_v52 }
 0x628   : > { %1707 = vmatpush.bf16.msra.mxu1 %v3911_v29  ;;  %1749 = vmatpush.bf16.msrb.mxu0 %v3935_v53  ;;  %v3874_v29 = vld [vmem:[%s4267_s3 + $0x50] sm:$0xff] }
 0x629   : > { %1721 = vmatpush.bf16.msra.mxu2 %v3919_v54  ;;  %1735 = vmatpush.bf16.msrb.mxu3 %v3927_v55  ;;  %v3882_v53 = vld [vmem:[%s4267_s3 + $0x90] sm:$0xff] }
 0x62c   : > { %1708 = vmatpush.bf16.msra.mxu1 %v3910_v34  ;;  %1750 = vmatpush.bf16.msrb.mxu0 %v3934_v56  ;;  %v3864_v34 = vld [vmem:[%s4267_s3] sm:$0xff] }
 0x62d   : > { %1722 = vmatpush.bf16.msra.mxu2 %v3918_v57  ;;  %1736 = vmatpush.bf16.msrb.mxu3 %v3926_v58  ;;  %v3888_v56 = vld [vmem:[%s4267_s3 + $0xc0] sm:$0xff]  ;;  %v3873_v57 = vld [vmem:[%s4267_s3 + $0x48] sm:$0xff] }
 0x62e   : > { %v3881_v58 = vld [vmem:[%s4267_s3 + $0x88] sm:$0xff] }
 0x630   : > { %1709 = vmatpush.bf16.msra.mxu1 %v3909_v59  ;;  %1751 = vmatpush.bf16.msrb.mxu0 %v3933_v60 }
 0x631   : > { %1723 = vmatpush.bf16.msra.mxu2 %v3917_v63  ;;  %1737 = vmatpush.bf16.msrb.mxu3 %v3925_v0  ;;  %v3872_v63 = vld [vmem:[%s4267_s3 + $0x40] sm:$0xff] }
 0x632   : > { %v3880_v0 = vld [vmem:[%s4267_s3 + $0x80] sm:$0xff] }
 0x634   : > { %1710 = vmatpush.bf16.msra.mxu1 %v3908_v61  ;;  %1752 = vmatpush.bf16.msrb.mxu0 %v3932_v62  ;;  %v1333_v61 = vld [vmem:[%s4262_s22 + $0x4] sm:$0xf] }
 0x635   : > { %1724 = vmatpush.bf16.msra.mxu2 %v3916_v3  ;;  %1738 = vmatpush.bf16.msrb.mxu3 %v3924_v20  ;;  %v1338_v3 = vperm.slane %v1333_v61, 3 }
 0x636   : > { %3245 = vmatmul.msk.bf16.vlgmr.msrb.gmra.mxu1 %vm533_vm2, %v4472_v52  ;;  %3246 = vmatmul.msk.bf16.vlgmr.msrb.gmra.mxu2 %vm533_vm2, %v4472_v52 }
 0x637   : > { %3247 = vmatmul.msk.bf16.vlgmr.msra.gmra.mxu3 %vm533_vm2, %v4472_v52  ;;  %3248 = vmatmul.msk.bf16.vlgmr.msra.gmra.mxu0 %vm533_vm2, %v4472_v52 }
 0x638   : > { %1711 = vmatpush.bf16.msra.mxu1 %v3907_v1  ;;  %1753 = vmatpush.bf16.msrb.mxu0 %v3931_v2  ;;  %v1335_v2 = vperm.slane %v1333_v61, 0 }
 0x639   : > { %1725 = vmatpush.bf16.msra.mxu2 %v3915_v5  ;;  %1739 = vmatpush.bf16.msrb.mxu3 %v3923_v6 }
 0x63c   : > { %1712 = vmatpush.bf16.msra.mxu1 %v3906_v25  ;;  %1754 = vmatpush.bf16.msrb.mxu0 %v3930_v4 }
 0x63d   : > { %1726 = vmatpush.bf16.msra.mxu2 %v3914_v9  ;;  %1740 = vmatpush.bf16.msrb.mxu3 %v3922_v10  ;;  %v3523_v10 = vld [vmem:[%s4257_s15 + $0xa0] sm:$0xf] }
 0x640   : > { %1713 = vmatpush.bf16.msra.mxu1 %v3905_v7  ;;  %1755 = vmatpush.bf16.msrb.mxu0 %v3929_v8  ;;  %v1336_v7 = vperm.slane %v1333_v61, 1 }
 0x641   : > { %1727 = vmatpush.bf16.msra.mxu2 %v3913_v17  ;;  %1741 = vmatpush.bf16.msrb.mxu3 %v3921_v18  ;;  %v3533_v17 = vld [vmem:[%s4257_s15 + $0xe8] sm:$0xf0] }
 0x644   : > { %1714 = vmatpush.bf16.msra.mxu1 %v3904_v11  ;;  %1756 = vmatpush.bf16.msrb.mxu0 %v3928_v14  ;;  %v3942_v11 = vld [vmem:[%s4257_s15 + $0xdc] sm:$0xf0]  ;;  %v1337_v14 = vperm.slane %v1333_v61, 2 }
 0x645   : > { %1728 = vmatpush.bf16.msra.mxu2 %v3912_v22  ;;  %1742 = vmatpush.bf16.msrb.mxu3 %v3920_v23  ;;  %v3524_v23 = vor.u32 %v3942_v11, %v3523_v10 }
 0x648   : > { %1955 = vmatpush.bf16.msrb.mxu1 %v3871_v15  ;;  %1997 = vmatpush.bf16.msra.mxu0 %v3895_v16  ;;  %v3941_v16 = vld [vmem:[%s4257_s15 + $0xac] sm:$0xf] }
 0x649   : > { %1969 = vmatpush.bf16.msrb.mxu2 %v3879_v24  ;;  %1983 = vmatpush.bf16.msra.mxu3 %v3887_v26 }
 0x64c   : > { %1956 = vmatpush.bf16.msrb.mxu1 %v3870_v19  ;;  %1998 = vmatpush.bf16.msra.mxu0 %v3894_v21 }
 0x64d   : > { %1970 = vmatpush.bf16.msrb.mxu2 %v3878_v13  ;;  %1984 = vmatpush.bf16.msra.mxu3 %v3886_v30  ;;  %v3938_v13 = vld [vmem:[%s4257_s15 + $0x5c] sm:$0xf0] }
 0x650   : > { %1957 = vmatpush.bf16.msrb.mxu1 %v3869_v27  ;;  %1999 = vmatpush.bf16.msra.mxu0 %v3893_v28  ;;  %v3536_v27 = vor.u32 %v3941_v16, %v3533_v17  ;;  %v3507_v28 = vld [vmem:[%s4257_s15 + $0x20] sm:$0xf] }
 0x651   : > { %1971 = vmatpush.bf16.msrb.mxu2 %v3877_v33  ;;  %1985 = vmatpush.bf16.msra.mxu3 %v3885_v35  ;;  %v3937_v33 = vld [vmem:[%s4257_s15 + $0x2c] sm:$0xf] }
 0x652   : > { %v3517_v35 = vld [vmem:[%s4257_s15 + $0x68] sm:$0xf0] }
 0x654   : > { %1958 = vmatpush.bf16.msrb.mxu1 %v3868_v31  ;;  %2000 = vmatpush.bf16.msra.mxu0 %v3892_v32 }
 0x655   : > { %1972 = vmatpush.bf16.msrb.mxu2 %v3876_v40  ;;  %1986 = vmatpush.bf16.msra.mxu3 %v3884_v41  ;;  %v3940_v40 = vld [vmem:[%s4257_s15 + $0xa4] sm:$0xf] }
 0x656   : > { %v3525_v41 = vld [vmem:[%s4257_s15 + $0xe0] sm:$0xf0] }
 0x658   : > { %1959 = vmatpush.bf16.msrb.mxu1 %v3867_v36  ;;  %2001 = vmatpush.bf16.msra.mxu0 %v3891_v37 }
 0x659   : > { %1973 = vmatpush.bf16.msrb.mxu2 %v3875_v44  ;;  %1987 = vmatpush.bf16.msra.mxu3 %v3883_v45  ;;  %v3508_v44 = vor.u32 %v3938_v13, %v3507_v28  ;;  %v3531_v45 = vld [vmem:[%s4257_s15 + $0xa8] sm:$0xf]  ;;  %v3948_v13 = vld [vmem:[%s4267_s3 + $0x220] sm:$0xff] }
 0x65a   : > { %v3973_v28 = vld [vmem:[%s4267_s3 + $0x2e8] sm:$0xff] }
 0x65c   : > { %1960 = vmatpush.bf16.msrb.mxu1 %v3866_v42  ;;  %2002 = vmatpush.bf16.msra.mxu0 %v3890_v43  ;;  %v1140_v42 = vld [vmem:[%s4262_s22] sm:$0xf] }
 0x65d   : > { %1974 = vmatpush.bf16.msrb.mxu2 %v3874_v29  ;;  %1988 = vmatpush.bf16.msra.mxu3 %v3882_v53  ;;  %v3520_v53 = vor.u32 %v3937_v33, %v3517_v35  ;;  %v1144_v11 = vperm.slane %v1140_v42, 2  ;;  %v3947_v33 = vld [vmem:[%s4267_s3 + $0x218] sm:$0xff]  ;;  %v3958_v35 = vld [vmem:[%s4267_s3 + $0x270] sm:$0xff] }
 0x660   : > { %1961 = vmatpush.bf16.msrb.mxu1 %v3865_v47  ;;  %2003 = vmatpush.bf16.msra.mxu0 %v3889_v48  ;;  %v3943_v47 = vld [vmem:[%s4257_s15 + $0xe4] sm:$0xf0] }
 0x661   : > { %1975 = vmatpush.bf16.msrb.mxu2 %v3873_v57  ;;  %1989 = vmatpush.bf16.msra.mxu3 %v3881_v58  ;;  %v3528_v57 = vor.u32 %v3940_v40, %v3525_v41  ;;  %v1142_v58 = vperm.slane %v1140_v42, 0  ;;  %v3971_v40 = vld [vmem:[%s4267_s3 + $0x2d8] sm:$0xff] }
 0x664   : > { %1962 = vmatpush.bf16.msrb.mxu1 %v3864_v34  ;;  %2004 = vmatpush.bf16.msra.mxu0 %v3888_v56 }
 0x665   : > { %1976 = vmatpush.bf16.msrb.mxu2 %v3872_v63  ;;  %1990 = vmatpush.bf16.msra.mxu3 %v3880_v0  ;;  %v3936_v63 = vld [vmem:[%s4257_s15 + $0x24] sm:$0xf] }
 0x666   : > { %v3509_v0 = vld [vmem:[%s4257_s15 + $0x60] sm:$0xf0] }
 0x6a3   : > { %v4538_v38 = vpop.f32.mrf.mxu1 }
 0x6a4   : > { %v4540_v39 = vpop.f32.mrf.mxu0 }
 0x6a9   : > { %v4548_v46 = vpop.f32.mrf.mxu2 }
 0x6aa   : > { %v4552_v49 = vpop.f32.mrf.mxu3 }
 0x6ab   : > { %v4556_v54 = vpop.f32.mrf.mxu1 }
 0x6ac   : > { %v4558_v55 = vpop.f32.mrf.mxu0 }
 0x6b1   : > { %v4564_v59 = vpop.f32.mrf.mxu2 }
 0x6b2   : > { %v4566_v60 = vpop.f32.mrf.mxu3 }
 0x6b3   : > { %v1392_v62 = vpop.f32.mrf.mxu1 }
 0x6b4   : > { %v1434_v1 = vpop.f32.mrf.mxu0  ;;  %v1393_v25 = vadd.f32 %v1392_v62, %v1335_v2  ;;  %v3532_v62 = vor.u32 %v3943_v47, %v3531_v45  ;;  %v3970_v45 = vld [vmem:[%s4267_s3 + $0x2d0] sm:$0xff]  ;;  %v3945_v47 = vld [vmem:[%s4267_s3 + $0x208] sm:$0xff] }
 0x6b5   : > { %v1435_v5 = vadd.f32 %v1434_v1, %v1338_v3  ;;  %v1145_v1 = vperm.slane %v1140_v42, 3 }
 0x6b6   : > { %v1439_v18 = vmax.f32 %v1393_v25, 0.0  ;;  %v1205_v25 = vadd.f32 %v4556_v54, %v1142_v58 }
 0x6b7   : > { %v1442_v21 = vmax.f32 %v1435_v5, 0.0  ;;  %v3512_v5 = vor.u32 %v3936_v63, %v3509_v0  ;;  %v3968_v63 = vld [vmem:[%s4267_s3 + $0x2c0] sm:$0xff] }
 0x6b8   : > { %v1253_v10 = vmax.f32 %v1205_v25, 0.0 }
 0x6b9   : > { %v1406_v20 = vpop.f32.mrf.mxu2 }
 0x6ba   : > { %v1420_v4 = vpop.f32.mrf.mxu3  ;;  %v1407_v24 = vadd.f32 %v1406_v20, %v1336_v7  ;;  %v3939_v20 = vld [vmem:[%s4257_s15 + $0x64] sm:$0xf0] }
 0x6bb   : > { %v1394_v6 = vpop.f32.mrf.mxu1  ;;  %v1421_v30 = vadd.f32 %v1420_v4, %v1337_v14  ;;  %v1247_v4 = vadd.f32 %v4558_v55, %v1145_v1  ;;  %v1233_v55 = vadd.f32 %v4566_v60, %v1144_v11  ;;  %v3950_v60 = vld [vmem:[%s4267_s3 + $0x230] sm:$0xff] }
 0x6bc   : > { %v1395_v8 = vadd.f32 %v1394_v6, %v1335_v2  ;;  %v1436_v9 = vpop.f32.mrf.mxu0  ;;  %v1440_v48 = vmax.f32 %v1407_v24, 0.0  ;;  %v1203_v6 = vadd.f32 %v4538_v38, %v1142_v58  ;;  %v1231_v38 = vadd.f32 %v4552_v49, %v1144_v11  ;;  %v3975_v49 = vld [vmem:[%s4267_s3 + $0x2f8] sm:$0xff] }
 0x6bd   : > { %v1437_v15 = vadd.f32 %v1436_v9, %v1338_v3  ;;  %v1441_v34 = vmax.f32 %v1421_v30, 0.0  ;;  %v3515_v3 = vld [vmem:[%s4257_s15 + $0x28] sm:$0xf]  ;;  %v1143_v9 = vperm.slane %v1140_v42, 1  ;;  %v3959_v30 = vld [vmem:[%s4267_s3 + $0x278] sm:$0xff]  ;;  %v3946_v42 = vld [vmem:[%s4267_s3 + $0x210] sm:$0xff] }
 0x6be   : > { %v1443_v19 = vmax.f32 %v1395_v8, 0.0  ;;  %v1245_v8 = vadd.f32 %v4540_v39, %v1145_v1  ;;  %v3955_v58 = vld [vmem:[%s4267_s3 + $0x258] sm:$0xff] }
 0x6bf   : > { %v1446_v22 = vmax.f32 %v1437_v15, 0.0  ;;  %v1249_v15 = vmax.f32 %v1203_v6, 0.0  ;;  %v1219_v54 = vadd.f32 %v4564_v59, %v1143_v9  ;;  %v1217_v17 = vadd.f32 %v4548_v46, %v1143_v9  ;;  %v3951_v46 = vld [vmem:[%s4267_s3 + $0x238] sm:$0xff] }
 0x6c0   : > { %v1447_v26 = vpack.c.bf16 %v1443_v19, %v1439_v18  ;;  %v1252_v16 = vmax.f32 %v1245_v8, 0.0  ;;  %v1251_v59 = vmax.f32 %v1231_v38, 0.0  ;;  %v3961_v8 = vld [vmem:[%s4267_s3 + $0x288] sm:$0xff]  ;;  %v3697_v38 = vld [vmem:[%s4257_s15 + $0xf8] sm:$0xf0] }
 0x6c1   : > { %v1450_v31 = vpack.c.bf16 %v1446_v22, %v1442_v21  ;;  %v1408_v32 = vpop.f32.mrf.mxu2  ;;  %v1257_v18 = vpack.c.bf16 %v1253_v10, %v1249_v15  ;;  %v1254_v39 = vmax.f32 %v1219_v54, 0.0  ;;  %v1255_v21 = vmax.f32 %v1233_v55, 0.0  ;;  %v3982_v15 = vld [vmem:[%s4257_s15 + $0xec] sm:$0xf0]  ;;  %v3981_v54 = vld [vmem:[%s4257_s15 + $0xbc] sm:$0xf] }
 0x6c2   : > { %v1409_v36 = vadd.f32 %v1408_v32, %v1336_v7  ;;  %v1422_v37 = vpop.f32.mrf.mxu3  ;;  %1715 = vmatmul.bf16.vlgmr.msra.gmra.mxu1 %v1447_v26  ;;  %v3516_v7 = vor.u32 %v3939_v20, %v3515_v3  ;;  %v1250_v22 = vmax.f32 %v1217_v17, 0.0  ;;  %v3974_v26 = vld [vmem:[%s4267_s3 + $0x2f0] sm:$0xff]  ;;  %v3972_v32 = vld [vmem:[%s4267_s3 + $0x2e0] sm:$0xff] }
 0x6c3   : > { %v1423_v43 = vadd.f32 %v1422_v37, %v1337_v14  ;;  %1757 = vmatmul.bf16.vlgmr.msrb.gmra.mxu0 %v1450_v31  ;;  %2075 = vmatpush.bf16.msra.mxu1 %v3524_v23  ;;  %v1256_v14 = vmax.f32 %v1247_v4, 0.0  ;;  %v1259_v24 = vpack.c.bf16 %v1255_v21, %v1251_v59  ;;  %v3967_v31 = vld [vmem:[%s4267_s3 + $0x2b8] sm:$0xff]  ;;  %v3966_v37 = vld [vmem:[%s4267_s3 + $0x2b0] sm:$0xff]  ;;  %v3952_v55 = vld [vmem:[%s4267_s3 + $0x240] sm:$0xff] }
 0x6c4   : > { %v1444_v29 = vmax.f32 %v1409_v36, 0.0  ;;  %2117 = vmatpush.bf16.msrb.mxu0 %v3536_v27  ;;  %v1258_v23 = vpack.c.bf16 %v1254_v39, %v1250_v22  ;;  %v3949_v27 = vld [vmem:[%s4267_s3 + $0x228] sm:$0xff]  ;;  %v3954_v3 = vld [vmem:[%s4267_s3 + $0x250] sm:$0xff]  ;;  %v3960_v17 = vld [vmem:[%s4267_s3 + $0x280] sm:$0xff]  ;;  %v3700_v39 = vor.u32 %v3981_v54, %v3697_v38 }
 0x6c5   : > { %v1445_v56 = vmax.f32 %v1423_v43, 0.0  ;;  %v1260_v19 = vpack.c.bf16 %v1256_v14, %v1252_v16  ;;  %v3957_v43 = vld [vmem:[%s4267_s3 + $0x268] sm:$0xff]  ;;  %v3962_v20 = vld [vmem:[%s4267_s3 + $0x290] sm:$0xff] }
 0x6c6   : > { %v1448_v61 = vpack.c.bf16 %v1444_v29, %v1440_v48  ;;  %v3956_v48 = vld [vmem:[%s4267_s3 + $0x260] sm:$0xff]  ;;  %v3687_v14 = vld [vmem:[%s4257_s15 + $0xb0] sm:$0xf] }
 0x6c7   : > { %v1449_v2 = vpack.c.bf16 %v1445_v56, %v1441_v34  ;;  %2076 = vmatpush.bf16.msra.mxu1 %v3508_v44  ;;  %v3965_v44 = vld [vmem:[%s4267_s3 + $0x2a8] sm:$0xff]  ;;  %v3964_v29 = vld [vmem:[%s4267_s3 + $0x2a0] sm:$0xff]  ;;  %v3671_v59 = vld [vmem:[%s4257_s15 + $0x30] sm:$0xf] }
 0x6c8   : > { %1729 = vmatmul.bf16.vlgmr.msra.gmra.mxu2 %v1448_v61  ;;  %2118 = vmatpush.bf16.msrb.mxu0 %v3520_v53  ;;  %v3969_v34 = vld [vmem:[%s4267_s3 + $0x2c8] sm:$0xff]  ;;  %v3963_v61 = vld [vmem:[%s4267_s3 + $0x298] sm:$0xff] }
 0x6c9   : > { %1743 = vmatmul.bf16.vlgmr.msrb.gmra.mxu3 %v1449_v2  ;;  %2089 = vmatpush.bf16.msra.mxu2 %v3528_v57  ;;  %v3944_v57 = vld [vmem:[%s4267_s3 + $0x200] sm:$0xff] }
 0x6ca   : > { %2103 = vmatpush.bf16.msrb.mxu3 %v3532_v62 }
 0x6cd   : > { %2090 = vmatpush.bf16.msra.mxu2 %v3512_v5 }
 0x6ce   : > { %2104 = vmatpush.bf16.msrb.mxu3 %v3516_v7  ;;  %v3953_v7 = vld [vmem:[%s4267_s3 + $0x248] sm:$0xff] }
 0x6d2   : > { %1963 = vmatmul.bf16.vlgmr.msrb.gmra.mxu1 %v1257_v18  ;;  %v3688_v18 = vor.u32 %v3982_v15, %v3687_v14 }
 0x6d3   : > { %2005 = vmatmul.bf16.vlgmr.msra.gmra.mxu0 %v1260_v19  ;;  %2393 = vmatpush.bf16.msrb.mxu1 %v3951_v46 }
 0x6d4   : > { %2435 = vmatpush.bf16.msra.mxu0 %v3975_v49 }
 0x6d7   : > { %2394 = vmatpush.bf16.msrb.mxu1 %v3950_v60  ;;  %v3681_v60 = vld [vmem:[%s4257_s15 + $0x78] sm:$0xf0] }
 0x6d8   : > { %1977 = vmatmul.bf16.vlgmr.msrb.gmra.mxu2 %v1258_v23  ;;  %2436 = vmatpush.bf16.msra.mxu0 %v3974_v26  ;;  %v3978_v23 = vld [vmem:[%s4257_s15 + $0x6c] sm:$0xf0] }
 0x6d9   : > { %1991 = vmatmul.bf16.vlgmr.msra.gmra.mxu3 %v1259_v24  ;;  %2407 = vmatpush.bf16.msrb.mxu2 %v3959_v30  ;;  %v3977_v24 = vld [vmem:[%s4257_s15 + $0x3c] sm:$0xf]  ;;  %v3672_v49 = vor.u32 %v3978_v23, %v3671_v59 }
 0x6da   : > { %2421 = vmatpush.bf16.msra.mxu3 %v3967_v31  ;;  %v2019_v31 = vld [vmem:[%s4262_s22 + $0x8] sm:$0xf] }
 0x6db   : > { %2395 = vmatpush.bf16.msrb.mxu1 %v3949_v27  ;;  %v3684_v27 = vor.u32 %v3977_v24, %v3681_v60  ;;  %v2022_v14 = vperm.slane %v2019_v31, 1  ;;  %v2023_v15 = vperm.slane %v2019_v31, 2  ;;  %v3991_v24 = vld [vmem:[%s4267_s3 + $0x338] sm:$0xff]  ;;  %v4014_v60 = vld [vmem:[%s4267_s3 + $0x3f0] sm:$0xff] }
 0x6dc   : > { %2437 = vmatpush.bf16.msra.mxu0 %v3973_v28 }
 0x6dd   : > { %2408 = vmatpush.bf16.msrb.mxu2 %v3958_v35  ;;  %v3689_v35 = vld [vmem:[%s4257_s15 + $0xf0] sm:$0xf0] }
 0x6de   : > { %2422 = vmatpush.bf16.msra.mxu3 %v3966_v37 }
 0x6df   : > { %2396 = vmatpush.bf16.msrb.mxu1 %v3948_v13 }
 0x6e0   : > { %2438 = vmatpush.bf16.msra.mxu0 %v3972_v32 }
 0x6e1   : > { %2409 = vmatpush.bf16.msrb.mxu2 %v3957_v43  ;;  %v3976_v43 = vld [vmem:[%s4257_s15 + $0x34] sm:$0xf] }
 0x6e2   : > { %3537 = vmatmul.msk.bf16.vlgmr.msra.gmra.mxu1 %vm533_vm2, %v4472_v52  ;;  %2423 = vmatpush.bf16.msra.mxu3 %v3965_v44  ;;  %v3673_v44 = vld [vmem:[%s4257_s15 + $0x70] sm:$0xf0] }
 0x6e3   : > { %3540 = vmatmul.msk.bf16.vlgmr.msrb.gmra.mxu0 %vm533_vm2, %v4472_v52  ;;  %2397 = vmatpush.bf16.msrb.mxu1 %v3947_v33  ;;  %v3980_v33 = vld [vmem:[%s4257_s15 + $0xb4] sm:$0xf] }
 0x6e4   : > { %2439 = vmatpush.bf16.msra.mxu0 %v3971_v40 }
 0x6e5   : > { %2410 = vmatpush.bf16.msrb.mxu2 %v3956_v48  ;;  %v3979_v48 = vld [vmem:[%s4257_s15 + $0x74] sm:$0xf0] }
 0x6e6   : > { %2424 = vmatpush.bf16.msra.mxu3 %v3964_v29  ;;  %v2021_v29 = vperm.slane %v2019_v31, 0 }
 0x6e7   : > { %2398 = vmatpush.bf16.msrb.mxu1 %v3946_v42  ;;  %v3983_v42 = vld [vmem:[%s4257_s15 + $0xf4] sm:$0xf0] }
 0x6e8   : > { %3538 = vmatmul.msk.bf16.vlgmr.msra.gmra.mxu2 %vm533_vm2, %v4472_v52  ;;  %2440 = vmatpush.bf16.msra.mxu0 %v3970_v45 }
 0x6e9   : > { %3539 = vmatmul.msk.bf16.vlgmr.msrb.gmra.mxu3 %vm533_vm2, %v4472_v52  ;;  %2411 = vmatpush.bf16.msrb.mxu2 %v3955_v58 }
 0x6ea   : > { %2425 = vmatpush.bf16.msra.mxu3 %v3963_v61 }
 0x6eb   : > { %2399 = vmatpush.bf16.msrb.mxu1 %v3945_v47  ;;  %v3679_v47 = vld [vmem:[%s4257_s15 + $0x38] sm:$0xf] }
 0x6ec   : > { %2441 = vmatpush.bf16.msra.mxu0 %v3969_v34  ;;  %v2024_v34 = vperm.slane %v2019_v31, 3  ;;  %v3999_v31 = vld [vmem:[%s4267_s3 + $0x378] sm:$0xff] }
 0x6ed   : > { %2412 = vmatpush.bf16.msrb.mxu2 %v3954_v3 }
 0x6ee   : > { %2426 = vmatpush.bf16.msra.mxu3 %v3962_v20 }
 0x6ef   : > { %2400 = vmatpush.bf16.msrb.mxu1 %v3944_v57  ;;  %v3680_v57 = vor.u32 %v3979_v48, %v3679_v47  ;;  %v4008_v47 = vld [vmem:[%s4267_s3 + $0x3c0] sm:$0xff] }
 0x6f0   : > { %2442 = vmatpush.bf16.msra.mxu0 %v3968_v63  ;;  %v3996_v48 = vld [vmem:[%s4267_s3 + $0x360] sm:$0xff] }
 0x6f1   : > { %2413 = vmatpush.bf16.msrb.mxu2 %v3953_v7 }
 0x6f2   : > { %2427 = vmatpush.bf16.msra.mxu3 %v3961_v8 }
 0x6f3   : > { %2515 = vmatpush.bf16.msra.mxu1 %v3688_v18 }
 0x6f4   : > { %2557 = vmatpush.bf16.msrb.mxu0 %v3700_v39 }
 0x6f5   : > { %2414 = vmatpush.bf16.msrb.mxu2 %v3952_v55 }
 0x6f6   : > { %2428 = vmatpush.bf16.msra.mxu3 %v3960_v17 }
 0x6f7   : > { %2516 = vmatpush.bf16.msra.mxu1 %v3672_v49  ;;  %v3990_v49 = vld [vmem:[%s4267_s3 + $0x330] sm:$0xff] }
 0x6f8   : > { %2558 = vmatpush.bf16.msrb.mxu0 %v3684_v27  ;;  %v4013_v27 = vld [vmem:[%s4267_s3 + $0x3e8] sm:$0xff] }
 0x73f   : > { %v1716_v36 = vpop.f32.mrf.mxu1 }
 0x740   : > { %v1758_v41 = vpop.f32.mrf.mxu0 }
 0x747   : > { %v1718_v53 = vpop.f32.mrf.mxu1 }
 0x748   : > { %v1760_v56 = vpop.f32.mrf.mxu0 }
 0x74b   : > { %v1730_v62 = vpop.f32.mrf.mxu2 }
 0x74c   : > { %v1731_v0 = vadd.f32 %v1730_v62, %v1716_v36  ;;  %v1744_v1 = vpop.f32.mrf.mxu3  ;;  %v3695_v36 = vld [vmem:[%s4257_s15 + $0xb8] sm:$0xf] }
 0x74d   : > { %v3696_v45 = vor.u32 %v3983_v42, %v3695_v36  ;;  %v3998_v36 = vld [vmem:[%s4267_s3 + $0x370] sm:$0xff]  ;;  %v4009_v42 = vld [vmem:[%s4267_s3 + $0x3c8] sm:$0xff] }
 0x74e   : > { %v1745_v2 = vadd.f32 %v1744_v1, %v1731_v0 }
 0x74f   : > { %v1964_v25 = vpop.f32.mrf.mxu1  ;;  %2543 = vmatpush.bf16.msrb.mxu3 %v3696_v45  ;;  %v3984_v45 = vld [vmem:[%s4267_s3 + $0x300] sm:$0xff] }
 0x750   : > { %v1759_v4 = vadd.f32 %v1758_v41, %v1745_v2  ;;  %v2006_v5 = vpop.f32.mrf.mxu0  ;;  %v3692_v41 = vor.u32 %v3980_v33, %v3689_v35  ;;  %v3986_v33 = vld [vmem:[%s4267_s3 + $0x310] sm:$0xff] }
 0x751   : > { %v4010_v35 = vld [vmem:[%s4267_s3 + $0x3d0] sm:$0xff] }
 0x752   : > { %v1965_v6 = vadd.f32 %v1964_v25, %v1759_v4  ;;  %2529 = vmatpush.bf16.msra.mxu2 %v3692_v41  ;;  %v3985_v41 = vld [vmem:[%s4267_s3 + $0x308] sm:$0xff] }
 0x753   : > { %v1732_v9 = vpop.f32.mrf.mxu2  ;;  %2544 = vmatpush.bf16.msrb.mxu3 %v3680_v57  ;;  %v4003_v57 = vld [vmem:[%s4267_s3 + $0x398] sm:$0xff] }
 0x754   : > { %v1733_v10 = vadd.f32 %v1732_v9, %v1718_v53  ;;  %v1746_v11 = vpop.f32.mrf.mxu3  ;;  %v3676_v53 = vor.u32 %v3976_v43, %v3673_v44  ;;  %v3997_v43 = vld [vmem:[%s4267_s3 + $0x368] sm:$0xff] }
 0x755   : > { %v4005_v44 = vld [vmem:[%s4267_s3 + $0x3a8] sm:$0xff] }
 0x756   : > { %v1747_v16 = vadd.f32 %v1746_v11, %v1733_v10  ;;  %2530 = vmatpush.bf16.msra.mxu2 %v3676_v53 }
 0x757   : > { %v1966_v19 = vpop.f32.mrf.mxu1 }
 0x758   : > { %v1761_v21 = vadd.f32 %v1760_v56, %v1747_v16  ;;  %v2008_v22 = vpop.f32.mrf.mxu0 }
 0x75a   : > { %v1967_v46 = vadd.f32 %v1966_v19, %v1761_v21 }
 0x75b   : > { %v1978_v26 = vpop.f32.mrf.mxu2 }
 0x75c   : > { %v1979_v28 = vadd.f32 %v1978_v26, %v1965_v6  ;;  %v1992_v13 = vpop.f32.mrf.mxu3  ;;  %v3989_v26 = vld [vmem:[%s4267_s3 + $0x328] sm:$0xff] }
 0x75e   : > { %v1993_v30 = vadd.f32 %v1992_v13, %v1979_v28  ;;  %v3988_v28 = vld [vmem:[%s4267_s3 + $0x320] sm:$0xff]  ;;  %v3987_v13 = vld [vmem:[%s4267_s3 + $0x318] sm:$0xff] }
 0x75f   : > { %v2078_v32 = vpop.f32.mrf.mxu1 }
 0x760   : > { %v4648_v37 = vadd.f32 %v2006_v5, %v1993_v30  ;;  %v2120_v40 = vpop.f32.mrf.mxu0  ;;  %v2079_v62 = vadd.f32 %v2078_v32, %v2021_v29  ;;  %v4011_v30 = vld [vmem:[%s4267_s3 + $0x3d8] sm:$0xff] }
 0x761   : > { %v2121_v0 = vadd.f32 %v2120_v40, %v2024_v34  ;;  %v4007_v32 = vld [vmem:[%s4267_s3 + $0x3b8] sm:$0xff]  ;;  %v4006_v40 = vld [vmem:[%s4267_s3 + $0x3b0] sm:$0xff] }
 0x762   : > { %v2125_v4 = vmax.f32 %v2079_v62, 0.0 }
 0x763   : > { %v1980_v56 = vpop.f32.mrf.mxu2  ;;  %v2128_v6 = vmax.f32 %v2121_v0, 0.0  ;;  %v3993_v0 = vld [vmem:[%s4267_s3 + $0x348] sm:$0xff] }
 0x764   : > { %v1981_v58 = vadd.f32 %v1980_v56, %v1967_v46  ;;  %v1994_v61 = vpop.f32.mrf.mxu3  ;;  %v4015_v46 = vld [vmem:[%s4267_s3 + $0x3f8] sm:$0xff] }
 0x765   : > { %v3995_v56 = vld [vmem:[%s4267_s3 + $0x358] sm:$0xff] }
 0x766   : > { %v1995_v63 = vadd.f32 %v1994_v61, %v1981_v58  ;;  %v3994_v58 = vld [vmem:[%s4267_s3 + $0x350] sm:$0xff] }
 0x767   : > { %v2080_v1 = vpop.f32.mrf.mxu1  ;;  %v4002_v61 = vld [vmem:[%s4267_s3 + $0x390] sm:$0xff] }
 0x768   : > { %v4655_v2 = vadd.f32 %v2008_v22, %v1995_v63  ;;  %v2081_v3 = vadd.f32 %v2080_v1, %v2021_v29  ;;  %v2122_v20 = vpop.f32.mrf.mxu0  ;;  %v4004_v29 = vld [vmem:[%s4267_s3 + $0x3a0] sm:$0xff]  ;;  %v4001_v1 = vld [vmem:[%s4267_s3 + $0x388] sm:$0xff] }
 0x769   : > { %v2123_v25 = vadd.f32 %v2122_v20, %v2024_v34  ;;  %v4000_v20 = vld [vmem:[%s4267_s3 + $0x380] sm:$0xff] }
 0x76a   : > { %v2129_v5 = vmax.f32 %v2081_v3, 0.0  ;;  %v3992_v3 = vld [vmem:[%s4267_s3 + $0x340] sm:$0xff] }
 0x76b   : > { %v2132_v7 = vmax.f32 %v2123_v25, 0.0  ;;  %v2092_v8 = vpop.f32.mrf.mxu2  ;;  %v2459_v25 = vld [vmem:[%s4262_s22 + $0xc] sm:$0xf] }
 0x76c   : > { %v2133_v9 = vpack.c.bf16 %v2129_v5, %v2125_v4  ;;  %v2106_v10 = vpop.f32.mrf.mxu3  ;;  %v2093_v54 = vadd.f32 %v2092_v8, %v2022_v14 }
 0x76d   : > { %v2136_v11 = vpack.c.bf16 %v2132_v7, %v2128_v6  ;;  %v2107_v16 = vadd.f32 %v2106_v10, %v2023_v15  ;;  %v2461_v7 = vperm.slane %v2459_v25, 0  ;;  %v2464_v10 = vperm.slane %v2459_v25, 3 }
 0x76e   : > { %2401 = vmatmul.bf16.vlgmr.msrb.gmra.mxu1 %v2133_v9  ;;  %v2126_v19 = vmax.f32 %v2093_v54, 0.0 }
 0x76f   : > { %2443 = vmatmul.bf16.vlgmr.msra.gmra.mxu0 %v2136_v11  ;;  %v2127_v21 = vmax.f32 %v2107_v16, 0.0  ;;  %2833 = vmatpush.bf16.msrb.mxu1 %v3991_v24 }
 0x770   : > { %2875 = vmatpush.bf16.msra.mxu0 %v4015_v46 }
 0x773   : > { %v2094_v55 = vpop.f32.mrf.mxu2  ;;  %2834 = vmatpush.bf16.msrb.mxu1 %v3990_v49 }
 0x774   : > { %v2095_v17 = vadd.f32 %v2094_v55, %v2022_v14  ;;  %v2108_v18 = vpop.f32.mrf.mxu3  ;;  %2876 = vmatpush.bf16.msra.mxu0 %v4014_v60 }
 0x775   : > { %v2109_v38 = vadd.f32 %v2108_v18, %v2023_v15 }
 0x776   : > { %v2130_v39 = vmax.f32 %v2095_v17, 0.0 }
 0x777   : > { %v2131_v22 = vmax.f32 %v2109_v38, 0.0  ;;  %2835 = vmatpush.bf16.msrb.mxu1 %v3989_v26 }
 0x778   : > { %v2134_v59 = vpack.c.bf16 %v2130_v39, %v2126_v19  ;;  %2877 = vmatpush.bf16.msra.mxu0 %v4013_v27 }
 0x779   : > { %v2135_v23 = vpack.c.bf16 %v2131_v22, %v2127_v21 }
 0x77a   : > { %2415 = vmatmul.bf16.vlgmr.msrb.gmra.mxu2 %v2134_v59 }
 0x77b   : > { %2429 = vmatmul.bf16.vlgmr.msra.gmra.mxu3 %v2135_v23  ;;  %2836 = vmatpush.bf16.msrb.mxu1 %v3988_v28 }
 0x77c   : > { %2847 = vmatpush.bf16.msrb.mxu2 %v3999_v31  ;;  %2861 = vmatpush.bf16.msra.mxu3 %v4007_v32 }
 0x77e   : > { %3701 = vmatmul.msk.bf16.vlgmr.msra.gmra.mxu1 %vm533_vm2, %v4472_v52 }
 0x77f   : > { %3704 = vmatmul.msk.bf16.vlgmr.msrb.gmra.mxu0 %vm533_vm2, %v4472_v52  ;;  %2837 = vmatpush.bf16.msrb.mxu1 %v3987_v13  ;;  %v2463_v13 = vperm.slane %v2459_v25, 2 }
 0x780   : > { %2848 = vmatpush.bf16.msrb.mxu2 %v3998_v36  ;;  %2862 = vmatpush.bf16.msra.mxu3 %v4006_v40 }
 0x783   : > { %2838 = vmatpush.bf16.msrb.mxu1 %v3986_v33 }
 0x784   : > { %2849 = vmatpush.bf16.msrb.mxu2 %v3997_v43  ;;  %2863 = vmatpush.bf16.msra.mxu3 %v4005_v44 }
 0x787   : > { %2839 = vmatpush.bf16.msrb.mxu1 %v3985_v41 }
 0x788   : > { %2850 = vmatpush.bf16.msrb.mxu2 %v3996_v48  ;;  %2864 = vmatpush.bf16.msra.mxu3 %v4004_v29 }
 0x78a   : > { %3702 = vmatmul.msk.bf16.vlgmr.msra.gmra.mxu2 %vm533_vm2, %v4472_v52 }
 0x78b   : > { %3703 = vmatmul.msk.bf16.vlgmr.msrb.gmra.mxu3 %vm533_vm2, %v4472_v52  ;;  %v4012_v52 = vld [vmem:[%s4267_s3 + $0x3e0] sm:$0xff]  ;;  %2840 = vmatpush.bf16.msrb.mxu1 %v3984_v45 }
 0x78c   : > { %2878 = vmatpush.bf16.msra.mxu0 %v4012_v52  ;;  %2851 = vmatpush.bf16.msrb.mxu2 %v3995_v56  ;;  %v2462_v52 = vperm.slane %v2459_v25, 1 }
 0x78d   : > { %2865 = vmatpush.bf16.msra.mxu3 %v4003_v57  ;;  %v4067_v57 = vld [vmem:[%s4252_s30 + $0x6] ss:$0 sm:$0xff] }
 0x790   : > { %2879 = vmatpush.bf16.msra.mxu0 %v4011_v30  ;;  %2852 = vmatpush.bf16.msrb.mxu2 %v3994_v58 }
 0x791   : > { %2866 = vmatpush.bf16.msra.mxu3 %v4002_v61 }
 0x794   : > { %2880 = vmatpush.bf16.msra.mxu0 %v4010_v35  ;;  %2853 = vmatpush.bf16.msrb.mxu2 %v3993_v0 }
 0x795   : > { %2867 = vmatpush.bf16.msra.mxu3 %v4001_v1 }
 0x798   : > { %2881 = vmatpush.bf16.msra.mxu0 %v4009_v42  ;;  %2854 = vmatpush.bf16.msrb.mxu2 %v3992_v3 }
 0x799   : > { %2868 = vmatpush.bf16.msra.mxu3 %v4000_v20 }
 0x79c   : > { %2882 = vmatpush.bf16.msra.mxu0 %v4008_v47 }
 0x7eb   : > { %v2402_v53 = vpop.f32.mrf.mxu1 }
 0x7ec   : > { %v2444_v34 = vpop.f32.mrf.mxu0 }
 0x7f3   : > { %v2404_v62 = vpop.f32.mrf.mxu1 }
 0x7f4   : > { %v2446_v63 = vpop.f32.mrf.mxu0 }
 0x7fb   : > { %v2518_v4 = vpop.f32.mrf.mxu1 }
 0x7fc   : > { %v2560_v5 = vpop.f32.mrf.mxu0  ;;  %v2519_v14 = vadd.f32 %v2518_v4, %v2461_v7 }
 0x7fd   : > { %v2416_v6 = vpop.f32.mrf.mxu2  ;;  %v2561_v54 = vadd.f32 %v2560_v5, %v2464_v10 }
 0x7fe   : > { %v2417_v8 = vadd.f32 %v2416_v6, %v2402_v53  ;;  %v2430_v9 = vpop.f32.mrf.mxu3  ;;  %v2565_v39 = vmax.f32 %v2519_v14, 0.0 }
 0x7ff   : > { %v2568_v23 = vmax.f32 %v2561_v54, 0.0 }
 0x800   : > { %v2431_v11 = vadd.f32 %v2430_v9, %v2417_v8 }
 0x802   : > { %v2445_v15 = vadd.f32 %v2444_v34, %v2431_v11 }
 0x803   : > { %v2520_v16 = vpop.f32.mrf.mxu1 }
 0x804   : > { %v2449_v55 = vadd.f32 %v2445_v15, %v4648_v37  ;;  %v2521_v17 = vadd.f32 %v2520_v16, %v2461_v7  ;;  %v2562_v18 = vpop.f32.mrf.mxu0 }
 0x805   : > { %v2563_v38 = vadd.f32 %v2562_v18, %v2464_v10  ;;  %v2418_v19 = vpop.f32.mrf.mxu2 }
 0x806   : > { %v2569_v21 = vmax.f32 %v2521_v17, 0.0  ;;  %v2419_v22 = vadd.f32 %v2418_v19, %v2404_v62  ;;  %v2432_v59 = vpop.f32.mrf.mxu3 }
 0x807   : > { %v2572_v24 = vmax.f32 %v2563_v38, 0.0 }
 0x808   : > { %v2573_v46 = vpack.c.bf16 %v2569_v21, %v2565_v39  ;;  %v2433_v49 = vadd.f32 %v2432_v59, %v2419_v22 }
 0x809   : > { %v2576_v60 = vpack.c.bf16 %v2572_v24, %v2568_v23 }
 0x80a   : > { %v2447_v26 = vadd.f32 %v2446_v63, %v2433_v49  ;;  %2841 = vmatmul.bf16.vlgmr.msrb.gmra.mxu1 %v2573_v46 }
 0x80b   : > { %2883 = vmatmul.bf16.vlgmr.msra.gmra.mxu0 %v2576_v60 }
 0x80c   : > { %v2450_v27 = vadd.f32 %v2447_v26, %v4655_v2 }
 0x80d   : > { %v2532_v28 = vpop.f32.mrf.mxu2 }
 0x80e   : > { %v2546_v37 = vpop.f32.mrf.mxu3  ;;  %v2533_v30 = vadd.f32 %v2532_v28, %v2462_v52  ;;  %v4068_v28 = vld [vmem:[%s4252_s30 + $0x4] ss:$0 sm:$0xff] }
 0x80f   : > { %v2547_v31 = vadd.f32 %v2546_v37, %v2463_v13 }
 0x810   : > { %v2566_v40 = vmax.f32 %v2533_v30, 0.0 }
 0x811   : > { %v2567_v42 = vmax.f32 %v2547_v31, 0.0 }
 0x815   : > { %v2534_v32 = vpop.f32.mrf.mxu2 }
 0x816   : > { %v2535_v33 = vadd.f32 %v2534_v32, %v2462_v52  ;;  %v2548_v35 = vpop.f32.mrf.mxu3 }
 0x817   : > { %v2549_v36 = vadd.f32 %v2548_v35, %v2463_v13  ;;  %v4069_v13 = vld [vmem:[%s4252_s30 + $0x5] ss:$0 sm:$0xff] }
 0x818   : > { %v2570_v41 = vmax.f32 %v2535_v33, 0.0 }
 0x819   : > { %v2571_v43 = vmax.f32 %v2549_v36, 0.0 }
 0x81a   : > { %v2574_v44 = vpack.c.bf16 %v2570_v41, %v2566_v40 }
 0x81b   : > { %v2575_v45 = vpack.c.bf16 %v2571_v43, %v2567_v42 }
 0x81c   : > { %2855 = vmatmul.bf16.vlgmr.msrb.gmra.mxu2 %v2574_v44 }
 0x81d   : > { %2869 = vmatmul.bf16.vlgmr.msra.gmra.mxu3 %v2575_v45 }
 0x887   : > { %v2842_v2 = vpop.f32.mrf.mxu1 }
 0x888   : > { %v2884_v53 = vpop.f32.mrf.mxu0 }
 0x88f   : > { %v2844_v61 = vpop.f32.mrf.mxu1 }
 0x890   : > { %v2886_v25 = vpop.f32.mrf.mxu0 }
 0x89f   : > { %v2856_v47 = vpop.f32.mrf.mxu2 }
 0x8a0   : > { %v2857_v48 = vadd.f32 %v2856_v47, %v2842_v2  ;;  %v2870_v29 = vpop.f32.mrf.mxu3 }
 0x8a2   : > { %v2871_v34 = vadd.f32 %v2870_v29, %v2857_v48 }
 0x8a4   : > { %v2885_v56 = vadd.f32 %v2884_v53, %v2871_v34 }
 0x8a6   : > { %v2889_v58 = vadd.f32 %v2885_v56, %v2449_v55 }
 0x8a7   : > { %v2858_v62 = vpop.f32.mrf.mxu2 }
 0x8a8   : > { %v2859_v63 = vadd.f32 %v2858_v62, %v2844_v61  ;;  %v2892_v0 = vadd.f32 %v4067_v57, %v2889_v58  ;;  %v2872_v1 = vpop.f32.mrf.mxu3 }
 0x8aa   : > { %v2873_v3 = vadd.f32 %v2872_v1, %v2859_v63  ;;  %v2894_v20 = vadd.f32 %v2892_v0, %v4466_v50 }
 0x8ac   : > { %v2887_v4 = vadd.f32 %v2886_v25, %v2873_v3  ;;  %v2896_v5 = vsel %vm533_vm2, %v2894_v20, 0.0 }
 0x8ad   : > { %2897 = vadd.xlane.f32.xlu2 %v2896_v5 }
 0x8ae   : > { %v2890_v6 = vadd.f32 %v2887_v4, %v2450_v27 }
 0x8b0   : > { %v2893_v7 = vadd.f32 %v4067_v57, %v2890_v6 }
 0x8b2   : > { %v2895_v8 = vadd.f32 %v2893_v7, %v4468_v51 }
 0x8b4   : > { %v2899_v9 = vsel %vm533_vm2, %v2895_v8, 0.0 }
 0x8b5   : > { %2900 = vadd.xlane.f32.xlu2 %v2899_v9 }
 0x920   : > { %v2898_v10 = vpop.xlane.xlu2 %2897 }
 0x921   : > { %v2902_v11 = vmul.f32 %v2898_v10, %v4409_v12 }
 0x923   : > { %v2904_v14 = vsub.f32 %v2894_v20, %v2902_v11 }
 0x925   : > { %v2906_v15 = vmul.f32 %v2904_v14, %v2904_v14 }
 0x927   : > { %v2908_v54 = vsel %vm533_vm2, %v2906_v15, 0.0 }
 0x928   : > { %2909 = vadd.xlane.f32.xlu2 %v2908_v54  ;;  %v2901_v50 = vpop.xlane.xlu2 %2900 }
 0x929   : > { %v2903_v16 = vmul.f32 %v2901_v50, %v4409_v12 }
 0x92b   : > { %v2905_v55 = vsub.f32 %v2895_v8, %v2903_v16 }
 0x92d   : > { %v2907_v17 = vmul.f32 %v2905_v55, %v2905_v55 }
 0x92f   : > { %v2911_v18 = vsel %vm533_vm2, %v2907_v17, 0.0 }
 0x930   : > { %2912 = vadd.xlane.f32.xlu1 %v2911_v18 }
 0x99b   : > { %v2910_v51 = vpop.xlane.xlu2 %2909 }
 0x99c   : > { %v2914_v38 = vmul.f32 %v2910_v51, %v4409_v12 }
 0x99e   : > { %v2916_v19 = vadd.f32 1e-05, %v2914_v38 }
 0x9a0   : > { %4108 = vrsqrt.f32 %v2916_v19  ;;  %vm2924_vm15 = vweird.f32 %v2916_v19 }
 0x9a3   : > { %v2913_v39 = vpop.xlane.xlu1 %2912 }
 0x9a4   : > { %v2915_v21 = vmul.f32 %v2913_v39, %v4409_v12 }
 0x9a6   : > { %v4109_v22 = vpop.eup %4108  ;;  %v2917_v59 = vadd.f32 1e-05, %v2915_v21 }
 0x9a7   : > { %v2919_v23 = vmul.f32 %v4109_v22, %v2916_v19  ;;  %vm2925_vm14 = vweird.f32 %v4109_v22 }
 0x9a8   : > { %4110 = vrsqrt.f32 %v2917_v59  ;;  %vm2926_vm0 = vmor %vm2924_vm15, %vm2925_vm14  ;;  %vm2934_vm3 = vweird.f32 %v2917_v59 }
 0x9a9   : > { %v2920_v24 = vmul.f32 %v4109_v22, %v2919_v23 }
 0x9ab   : > { %v2921_v46 = vmul.f32 0.5, %v2920_v24 }
 0x9ad   : > { %v2922_v49 = vsub.f32 1.5, %v2921_v46 }
 0x9ae   : > { %v4111_v60 = vpop.eup %4110 }
 0x9af   : > { %v2923_v26 = vmul.f32 %v4109_v22, %v2922_v49  ;;  %v2929_v27 = vmul.f32 %v4111_v60, %v2917_v59  ;;  %vm2935_vm1 = vweird.f32 %v4111_v60 }
 0x9b0   : > { %vm2936_vm4 = vmor %vm2934_vm3, %vm2935_vm1 }
 0x9b1   : > { %v2927_v37 = vsel %vm2926_vm0, %v4109_v22, %v2923_v26  ;;  %v2930_v52 = vmul.f32 %v4111_v60, %v2929_v27 }
 0x9b2   : > { %v2938_v30 = vmul.f32 %v2927_v37, %v2904_v14 }
 0x9b3   : > { %v2931_v12 = vmul.f32 0.5, %v2930_v52 }
 0x9b4   : > { %v2941_v31 = vmul.f32 %v4068_v28, %v2938_v30 }
 0x9b5   : > { %v2932_v32 = vsub.f32 1.5, %v2931_v12 }
 0x9b6   : > { %v2944_v33 = vadd.f32 %v4069_v13, %v2941_v31 }
 0x9b7   : > { %v2933_v35 = vmul.f32 %v4111_v60, %v2932_v32 }
 0x9b8   : > { %2946 = vst.msk [vmem:[#allocation2] sm:$0xff] %vm533_vm2, %v2944_v33 }
 0x9b9   : > { %v2937_v36 = vsel %vm2936_vm4, %v4111_v60, %v2933_v35 }
 0x9ba   : > { %v2939_v40 = vmul.f32 %v2937_v36, %v2905_v55 }
 0x9bc   : > { %v2942_v41 = vmul.f32 %v4068_v28, %v2939_v40  ;;  %2951 = sbr.rel (%p3833_p5) target bundleno = 2653 (0xa5d), region = 72 }
 0x9be   : > { %v2945_v42 = vadd.f32 %v4069_v13, %v2942_v41 }
 0x9c0   : > { %2947 = vst.msk [vmem:[#allocation2 + $0x8] sm:$0xff] %vm533_vm2, %v2945_v42 }
 0x9c1   : > { %v4017_v43 = vld [vmem:[%s4744_s9 + $0x8] sm:$0xff]  ;;  %v2952_v44 = vsel %vm533_vm2, %v2944_v33, 0.0  ;;  %v2959_v45 = vsel %vm533_vm2, %v2945_v42, 0.0  ;;  %v4016_v48 = vld [vmem:[%s4744_s9] sm:$0xff]  ;;  %vm2982_vm5 = vcmask 1041409   ;;  %vm3013_vm6 = vcmask 58368  }
 0x9c2   : > { %v2953_v2 = vrot.slane %v2952_v44, 4  ;;  %v2960_v47 = vrot.slane %v2959_v45, 4  ;;  %3006 = vmatpush.bf16.msra.mxu0 %v4017_v43  ;;  %v4112_v8 = vld [vmem:[%s4745_s10] ss:$0 sm:$0xff] }
 0x9c4   : > { %v2954_v29 = vadd.f32 %v2953_v2, %v2952_v44  ;;  %v2961_v53 = vadd.f32 %v2960_v47, %v2959_v45 }
 0x9c6   : > { %v2955_v34 = vrot.slane %v2954_v29, 2  ;;  %v2962_v56 = vrot.slane %v2961_v53, 2  ;;  %3007 = vmatpush.bf16.msra.mxu0 %v4016_v48 }
 0x9c8   : > { %v2956_v57 = vadd.f32 %v2955_v34, %v2954_v29  ;;  %v2963_v58 = vadd.f32 %v2962_v56, %v2961_v53 }
 0x9ca   : > { %v2957_v61 = vrot.slane %v2956_v57, 1  ;;  %v2964_v62 = vrot.slane %v2963_v58, 1 }
 0x9cc   : > { %v2958_v63 = vadd.f32 %v2957_v61, %v2956_v57  ;;  %v2965_v0 = vadd.f32 %v2964_v62, %v2963_v58 }
 0x9ce   : > { %v2966_v1 = vmul.f32 0.125, %v2958_v63  ;;  %v2967_v3 = vmul.f32 0.125, %v2965_v0 }
 0x9d0   : > { %v2968_v20 = vpack.c.bf16 %v2966_v1, %v2966_v1  ;;  %v2969_v25 = vpack.c.bf16 %v2967_v3, %v2967_v3 }
 0x9d2   : > { %v2980_v4 = vunpack.c.l.b16 %v2968_v20  ;;  %v2981_v5 = vunpack.c.l.b16 %v2969_v25 }
 0x9d4   : > { %v2983_v6 = vsel %vm2982_vm5, %v2981_v5, %v2980_v4 }
 0x9d5   : > { %v2984_v7 = vpack.c.b16 %v2983_v6, %v2983_v6 }
 0x9d7   : > { %3842 = vmatmul.msk.bf16.vlgmr.msra.gmra.mxu0 %vm533_vm2, %v2984_v7 }
 0xa54   : > { %v3009_v9 = vpop.f32.mrf.mxu0 }
 0xa55   : > { %v3010_v10 = vadd.f32 %v4112_v8, %v3009_v9 }
 0xa57   : > { %3014 = vst.msk [vmem:[#allocation3] sm:$0x3] %vm3013_vm6, %v3010_v10 }
 0xa5c   : > { %v3011_v11 = vpop.f32.mrf.mxu0 }
 0xa5d PF: > { %p4022_p6 = scmp.eq.s32.totalorder %s4235_s18, 1  ;;  %s4168_s23 = smov [#allocation3]  }
 0xa5e   : > { %s3021_s25 = sshll.u32 %s4168_s23, 4  ;;  %s3023_s28 = sshll.u32 %s4746_s11, 4  ;;  %s3022_s25 = int_to_ptr.vmem [resolvable:$true] %s3021_s25  ;;  %s3024_s28 = int_to_ptr.hbm [resolvable:$true] %s3023_s28 }
 0xa5f   : > { %4019 = dma.vmem_to_hbm [thread:$0]  (%p4022_p6), %s3022_s25, 32, %s3024_s28, [#allocation4]  }
 0xa60   : > { %4146 = dma.done.wait (%p4022_p6), [#allocation4], 32  }
 0xa61   : > { %4148 = vsyncadd (%p4022_p6), [#allocation4], 4294967264 }
 0xa62 PF: > { %s4751_s29 = sld [smem:[#allocation6_spill]] }
 0xa68   : > { %s22_s17 = sadd.s32 1, %s4751_s29  }
 0xa69   : > { %p19_p7 = scmp.ge.s32.totalorder %s22_s17, 4  }
 0xa6b   :  { %21 = sbr.rel (!%p19_p7) target bundleno = 3 (0x3), region = 114 }
 0xa70   :  { %3037 = vsyncpa [#allocation4], 1 }
 0xa71   :  { %3039 = vsyncpa [#allocation4 + $0x1], 1 }

</bundles_post_ra>
